<compile_context>
chip_gen: v7x
topology: tpu7x:2x2x1
jax: 0.10.0
libtpu: 0.0.40
codegen_flags: <defaults>
</compile_context>

<pallas_src>
import jax
import jax.numpy as jnp
from jax import lax
from jax.experimental import pallas as pl
from jax.experimental.pallas import tpu as pltpu


# ----------------------------------------------------------------------------
# Fused kernel: 3 x (3x3 conv + folded-BN affine + Mish) over a block of images
# ----------------------------------------------------------------------------
def fused_block_kernel(x_ref, w1_ref, s1_ref, b1_ref,
                       w2_ref, s2_ref, b2_ref,
                       w3_ref, s3_ref, b3_ref,
                       o_ref, pad_a, pad_b):
    # x_ref : (B_blk, H, W*Cin)   f32  activation rows, channels packed on lanes
    # wX_ref: (3, W*CinX, W*CoutX) bf16 banded per-ky weight matrices
    # sX/bX : (1, W*CoutX)        f32  folded BN scale / bias, tiled over W
    # o_ref : (B_blk, H, W*Cout)  f32  lane-dense output
    # pad_a, pad_b: (B_blk*(H+8)+8, W*Cmax) bf16 stacked halo-padded activations.
    #   Image i interior at rows [8 + i*R, 8 + i*R + H), R = H + 8; the 8-row
    #   gaps / leading / trailing rows stay zero and supply the H-direction halo.
    #   W-direction zero padding is folded into the banded weights, so the body
    #   contains no reshapes/concats.
    B = x_ref.shape[0]
    H = x_ref.shape[1]
    wc_in = x_ref.shape[2]
    R = H + 8                        # per-image row stride (sublane aligned)
    OFF = 8                          # interior row offset inside each slab
    M = B * R - 8                    # stacked matmul M (covers all valid rows)

    @pl.when(pl.program_id(0) == 0)
    def _init():
        # Only halo/gap rows must be zero; interiors are fully overwritten every
        # step and scratch persists across the grid, so zero the pads just once.
        pad_a[...] = jnp.zeros_like(pad_a)
        pad_b[...] = jnp.zeros_like(pad_b)

    def conv_bn_mish(src_ref, k_cols, wb_ref, s_ref, b_ref):
        # 3x3 conv as 3 per-ky matmuls over the stacked rows.  Result row r is
        # the conv centered at padded row r + 8, so image i's valid rows are the
        # sublane-aligned slab [i*R, i*R + H); gap rows are junk and skipped.
        # TODO(synk): for W*Cin > ~256 switch to 9 shifted K=Cin matmuls
        #             (exact-FLOP, O(Cin*Cout) weights) instead of banded K=W*Cin.
        acc = jnp.dot(src_ref[7:7 + M, :k_cols], wb_ref[0],
                      preferred_element_type=jnp.float32)
        acc = acc + jnp.dot(src_ref[8:8 + M, :k_cols], wb_ref[1],
                            preferred_element_type=jnp.float32)
        acc = acc + jnp.dot(src_ref[9:9 + M, :k_cols], wb_ref[2],
                            preferred_element_type=jnp.float32)
        # Folded BatchNorm (eval) affine, f32, lane-dense.
        y = acc * s_ref[...] + b_ref[...]
        # Mish: y*tanh(softplus(y)) == y*u/(u+2), u = e^y (e^y + 2).
        # Threshold-20 branch matches PyTorch's softplus threshold.
        t = jnp.exp(jnp.minimum(y, 20.0))
        u = t * (t + 2.0)
        return jnp.where(y > 20.0, y,
                         y * u * pl.reciprocal(u + 2.0, approx=True))

    # Layer 1: input block -> pad_a interiors (bf16).
    for i in range(B):
        pad_a[OFF + i * R:OFF + i * R + H, :wc_in] = (
            x_ref[i].astype(pad_a.dtype))
    h1 = conv_bn_mish(pad_a, wc_in, w1_ref, s1_ref, b1_ref)      # (M, W*Cmid) f32
    wc1 = h1.shape[1]

    # Layer 2: h1 -> pad_b interiors.
    for i in range(B):
        pad_b[OFF + i * R:OFF + i * R + H, :wc1] = (
            h1[i * R:i * R + H].astype(pad_b.dtype))
    h2 = conv_bn_mish(pad_b, wc1, w2_ref, s2_ref, b2_ref)        # (M, W*Cmid) f32
    wc2 = h2.shape[1]

    # Layer 3: h2 -> pad_a interiors (ping-pong reuse), result straight to output.
    # TODO(synk): when VMEM-tight (v7x) a single pad buffer suffices since each
    #             layer's result is fully materialized in vregs before write-back.
    for i in range(B):
        pad_a[OFF + i * R:OFF + i * R + H, :wc2] = (
            h2[i * R:i * R + H].astype(pad_a.dtype))
    h3 = conv_bn_mish(pad_a, wc2, w3_ref, s3_ref, b3_ref)        # (M, W*Cout) f32

    for i in range(B):
        o_ref[i] = h3[i * R:i * R + H].astype(o_ref.dtype)


# ----------------------------------------------------------------------------
# Parameter packing (hoisted out of the per-call path) + pallas_call wrapper
# ----------------------------------------------------------------------------
def _banded_weight(w_hwio, W):
    """(3,3,Cin,Cout) HWIO weight -> (3, W*Cin, W*Cout) banded per-ky matrices.

    B[ky, q*Cin+ci, w*Cout+co] = w[ky, kx, ci, co] where q = w + kx - 1;
    taps falling outside [0, W) are dropped (== the zero W-padding)."""
    _, _, cin, cout = w_hwio.shape
    kx = jnp.arange(3)[:, None, None]
    q = jnp.arange(W)[None, :, None]
    wc = jnp.arange(W)[None, None, :]
    S = (q == wc + kx - 1).astype(jnp.float32)               # (3, W, W)
    band = jnp.einsum('kqw,ykio->yqiwo', S, w_hwio.astype(jnp.float32))
    return band.reshape(3, W * cin, W * cout)


def pack_block_params(params, W, compute_dtype=jnp.bfloat16):
    """One-time packing per parameter set: banded bf16 weights + BN scale/bias
    (conv bias folded in) tiled to the (W*C) lane layout."""
    packed = []
    for p in params:
        cout = p["w"].shape[-1]
        packed.append(dict(
            wb=_banded_weight(p["w"], W).astype(compute_dtype),
            s=jnp.tile(p["scale"], W).reshape(1, W * cout).astype(jnp.float32),
            b=jnp.tile(p["bias"], W).reshape(1, W * cout).astype(jnp.float32),
        ))
    return packed


def _pick_batch_block(N, H):
    """Largest divisor of N whose stacked row count keeps the MXU well fed
    (target M up to ~256) without blowing up the VMEM pads."""
    # TODO(synk): on v7x prefer a choice that also leaves >= 2 grid steps so the
    #             batch shards across both TensorCores.
    b = 1
    for d in range(1, N + 1):
        if N % d == 0 and d * H <= 256:
            b = d
    return b


def _block_forward(x_nchw, packed):
    """Forward pass of Block. Input/output are NCHW like the PyTorch module."""
    N, Cin, H, W = x_nchw.shape
    Cmid = packed[0]["wb"].shape[2] // W
    Cout = packed[-1]["wb"].shape[2] // W
    Cmax = max(Cin, Cmid)
    B_blk = _pick_batch_block(N, H)
    R = H + 8
    TOT = B_blk * R + 8

    # NCHW -> NHWC -> (N, H, W*Cin): channels packed along lanes.
    # TODO(synk): drop these transposes if the surrounding model is NHWC-native.
    x = jnp.transpose(x_nchw, (0, 2, 3, 1)).reshape(N, H, W * Cin)

    args = [x]
    in_specs = [pl.BlockSpec((B_blk, H, W * Cin), lambda n: (n, 0, 0))]
    for p in packed:
        args += [p["wb"], p["s"], p["b"]]
        in_specs += [
            pl.BlockSpec(p["wb"].shape, lambda n: (0, 0, 0)),
            pl.BlockSpec(p["s"].shape, lambda n: (0, 0)),
            pl.BlockSpec(p["b"].shape, lambda n: (0, 0)),
        ]

    # Explicit VMEM budget: 2 bf16 scratch pads + (conservatively) double-
    # buffered I/O blocks and grid-invariant parameters, with headroom.
    pad_bytes = 2 * TOT * (W * Cmax) * 2
    io_bytes = 2 * B_blk * H * W * (Cin + Cout) * 4
    par_bytes = 2 * sum(int(a.nbytes) for a in args[1:])
    vmem_limit = min(max(2 * (pad_bytes + io_bytes + par_bytes), 16 << 20),
                     48 << 20)

    out = pl.pallas_call(
        fused_block_kernel,
        out_shape=jax.ShapeDtypeStruct((N, H, W * Cout), x.dtype),
        grid=(N // B_blk,),
        in_specs=in_specs,
        out_specs=pl.BlockSpec((B_blk, H, W * Cout), lambda n: (n, 0, 0)),
        scratch_shapes=[pltpu.VMEM((TOT, W * Cmax), jnp.bfloat16),
                        pltpu.VMEM((TOT, W * Cmax), jnp.bfloat16)],
        compiler_params=pltpu.CompilerParams(
            dimension_semantics=("parallel",),
            vmem_limit_bytes=vmem_limit),
    )(*args)

    # (N, H, W*Cout) -> NHWC -> NCHW
    return jnp.transpose(out.reshape(N, H, W, Cout), (0, 3, 1, 2))


block_forward = jax.jit(_block_forward)


# ----------------------------------------------------------------------------
# Parameters (Conv2d + BatchNorm2d eval-mode, folded) and pure-JAX reference
# ----------------------------------------------------------------------------
def make_layer_params(key, cin, cout):
    k = jax.random.split(key, 6)
    w = jax.random.normal(k[0], (3, 3, cin, cout), jnp.float32) * 0.1   # HWIO conv weight
    b = jax.random.normal(k[1], (cout,), jnp.float32) * 0.1             # conv bias
    gamma = 1.0 + 0.1 * jax.random.normal(k[2], (cout,), jnp.float32)   # BN weight
    beta = 0.1 * jax.random.normal(k[3], (cout,), jnp.float32)          # BN bias
    rmean = 0.05 * jax.random.normal(k[4], (cout,), jnp.float32)        # BN running_mean
    rvar = 1.0 + 0.1 * jax.random.uniform(k[5], (cout,), jnp.float32)   # BN running_var
    eps = 1e-5
    scale = gamma / jnp.sqrt(rvar + eps)
    bias_total = (b - rmean) * scale + beta                             # fold conv bias + BN
    return dict(w=w, scale=scale, bias=bias_total)


def block_forward_ref(x_nchw, params):
    x = jnp.transpose(x_nchw, (0, 2, 3, 1))
    for p in params:
        y = lax.conv_general_dilated(
            x, p["w"], window_strides=(1, 1), padding="SAME",
            dimension_numbers=("NHWC", "HWIO", "NHWC"))
        y = y * p["scale"] + p["bias"]
        sp = jnp.where(y > 20.0, y, jnp.log1p(jnp.exp(jnp.minimum(y, 20.0))))
        x = y * jnp.tanh(sp)
    return jnp.transpose(x, (0, 3, 1, 2))


if __name__ == "__main__":
    in_channels, out_channels = 4, 8
    mid_channels = out_channels           # PyTorch default when mid_channels is None
    N, H, W = 2, 16, 16

    key = jax.random.PRNGKey(0)
    kx_, k1, k2, k3 = jax.random.split(key, 4)

    x = jax.random.normal(kx_, (N, in_channels, H, W), jnp.float32)     # NCHW input
    params = [
        make_layer_params(k1, in_channels, mid_channels),
        make_layer_params(k2, mid_channels, mid_channels),
        make_layer_params(k3, mid_channels, out_channels),
    ]
    packed = pack_block_params(params, W)     # hoisted: once per parameter set

    out = jax.block_until_ready(block_forward(x, packed))
    ref = jax.block_until_ready(block_forward_ref(x, params))

    assert out.shape == (N, out_channels, H, W), out.shape
    # bf16 matmul inputs + approx reciprocal => relaxed tolerance vs f32 reference.
    assert jnp.allclose(out, ref, rtol=5e-2, atol=5e-2), \
        f"max abs err = {jnp.max(jnp.abs(out - ref))}"

    print("KERNEL_OK")
</pallas_src>

<mosaic_0001>
module attributes {stable_mosaic.version = 11 : i64} {
  func.func @fused_block_kernel(%arg0: i32, %arg1: memref<2x16x64xf32, #tpu.memory_space<vmem>>, %arg2: memref<3x64x128xbf16, #tpu.memory_space<vmem>>, %arg3: memref<1x128xf32, #tpu.memory_space<vmem>>, %arg4: memref<1x128xf32, #tpu.memory_space<vmem>>, %arg5: memref<3x128x128xbf16, #tpu.memory_space<vmem>>, %arg6: memref<1x128xf32, #tpu.memory_space<vmem>>, %arg7: memref<1x128xf32, #tpu.memory_space<vmem>>, %arg8: memref<3x128x128xbf16, #tpu.memory_space<vmem>>, %arg9: memref<1x128xf32, #tpu.memory_space<vmem>>, %arg10: memref<1x128xf32, #tpu.memory_space<vmem>>, %arg11: memref<2x16x128xf32, #tpu.memory_space<vmem>>, %arg12: memref<56x128xbf16, #tpu.memory_space<vmem>>, %arg13: memref<56x128xbf16, #tpu.memory_space<vmem>>) attributes {dimension_semantics = [#tpu.dimension_semantics<parallel>], iteration_bounds = array<i64: 1>, scalar_prefetch = 0 : i64, scratch_operands = 2 : i64, tpu.core_type = #tpu.core_type<tc>, window_params = [{transform_indices = @transform_0, window_bounds = array<i64: 2, 16, 64>}, {pipeline_mode = #tpu.pipeline_mode<synchronous>, transform_indices = @transform_1, window_bounds = array<i64: 3, 64, 128>}, {pipeline_mode = #tpu.pipeline_mode<synchronous>, transform_indices = @transform_2, window_bounds = array<i64: 1, 128>}, {pipeline_mode = #tpu.pipeline_mode<synchronous>, transform_indices = @transform_3, window_bounds = array<i64: 1, 128>}, {pipeline_mode = #tpu.pipeline_mode<synchronous>, transform_indices = @transform_4, window_bounds = array<i64: 3, 128, 128>}, {pipeline_mode = #tpu.pipeline_mode<synchronous>, transform_indices = @transform_5, window_bounds = array<i64: 1, 128>}, {pipeline_mode = #tpu.pipeline_mode<synchronous>, transform_indices = @transform_6, window_bounds = array<i64: 1, 128>}, {pipeline_mode = #tpu.pipeline_mode<synchronous>, transform_indices = @transform_7, window_bounds = array<i64: 3, 128, 128>}, {pipeline_mode = #tpu.pipeline_mode<synchronous>, transform_indices = @transform_8, window_bounds = array<i64: 1, 128>}, {pipeline_mode = #tpu.pipeline_mode<synchronous>, transform_indices = @transform_9, window_bounds = array<i64: 1, 128>}, {transform_indices = @transform_10, window_bounds = array<i64: 2, 16, 128>}]} {
    %c0_i32 = arith.constant 0 : i32
    %0 = arith.cmpi eq, %arg0, %c0_i32 : i32
    %1 = arith.extui %0 : i1 to i32
    %c0_i32_0 = arith.constant 0 : i32
    %2 = arith.cmpi ne, %1, %c0_i32_0 : i32
    scf.if %2 {
      %cst_95 = arith.constant 0.000000e+00 : bf16
      %133 = vector.broadcast %cst_95 : bf16 to vector<56x128xbf16>
      %c0_96 = arith.constant 0 : index
      %c0_97 = arith.constant 0 : index
      %134 = vector.load %arg12[%c0_96, %c0_97] : memref<56x128xbf16, #tpu.memory_space<vmem>>, vector<56x128xbf16>
      tpu.vector_store %arg12[%c0_96, %c0_97], %133 {strides = array<i32>} : memref<56x128xbf16, #tpu.memory_space<vmem>>, vector<56x128xbf16>,
      %cst_98 = arith.constant 0.000000e+00 : bf16
      %135 = vector.broadcast %cst_98 : bf16 to vector<56x128xbf16>
      %c0_99 = arith.constant 0 : index
      %c0_100 = arith.constant 0 : index
      %136 = vector.load %arg13[%c0_99, %c0_100] : memref<56x128xbf16, #tpu.memory_space<vmem>>, vector<56x128xbf16>
      tpu.vector_store %arg13[%c0_99, %c0_100], %135 {strides = array<i32>} : memref<56x128xbf16, #tpu.memory_space<vmem>>, vector<56x128xbf16>,
    } else {
    }
    %c0 = arith.constant 0 : index
    %c0_1 = arith.constant 0 : index
    %c0_2 = arith.constant 0 : index
    %3 = vector.load %arg1[%c0, %c0_1, %c0_2] : memref<2x16x64xf32, #tpu.memory_space<vmem>>, vector<1x16x64xf32>
    %4 = vector.shape_cast %3 : vector<1x16x64xf32> to vector<16x64xf32>
    %5 = arith.truncf %4 : vector<16x64xf32> to vector<16x64xbf16>
    %c8 = arith.constant 8 : index
    %c0_3 = arith.constant 0 : index
    %6 = vector.load %arg12[%c8, %c0_3] : memref<56x128xbf16, #tpu.memory_space<vmem>>, vector<16x64xbf16>
    tpu.vector_store %arg12[%c8, %c0_3], %5 {strides = array<i32>} : memref<56x128xbf16, #tpu.memory_space<vmem>>, vector<16x64xbf16>,
    %c1 = arith.constant 1 : index
    %c0_4 = arith.constant 0 : index
    %c0_5 = arith.constant 0 : index
    %7 = vector.load %arg1[%c1, %c0_4, %c0_5] : memref<2x16x64xf32, #tpu.memory_space<vmem>>, vector<1x16x64xf32>
    %8 = vector.shape_cast %7 : vector<1x16x64xf32> to vector<16x64xf32>
    %9 = arith.truncf %8 : vector<16x64xf32> to vector<16x64xbf16>
    %c32 = arith.constant 32 : index
    %c0_6 = arith.constant 0 : index
    %10 = vector.load %arg12[%c32, %c0_6] : memref<56x128xbf16, #tpu.memory_space<vmem>>, vector<16x64xbf16>
    tpu.vector_store %arg12[%c32, %c0_6], %9 {strides = array<i32>} : memref<56x128xbf16, #tpu.memory_space<vmem>>, vector<16x64xbf16>,
    %c7 = arith.constant 7 : index
    %c0_7 = arith.constant 0 : index
    %11 = vector.load %arg12[%c7, %c0_7] : memref<56x128xbf16, #tpu.memory_space<vmem>>, vector<40x64xbf16>
    %c0_8 = arith.constant 0 : index
    %c0_9 = arith.constant 0 : index
    %c0_10 = arith.constant 0 : index
    %12 = vector.load %arg2[%c0_8, %c0_9, %c0_10] : memref<3x64x128xbf16, #tpu.memory_space<vmem>>, vector<1x64x128xbf16>
    %13 = vector.shape_cast %12 : vector<1x64x128xbf16> to vector<64x128xbf16>
    %cst = arith.constant dense<0.000000e+00> : vector<40x128xf32>
    %14 = tpu.matmul %11, %13, %cst {dimension_numbers = #tpu.dot_dimension_numbers<[1], [0], [0], [1], [0, 0, 1, 1], [], []>} : vector<40x64xbf16>, vector<64x128xbf16>, vector<40x128xf32> -> vector<40x128xf32>
    %c8_11 = arith.constant 8 : index
    %c0_12 = arith.constant 0 : index
    %15 = vector.load %arg12[%c8_11, %c0_12] : memref<56x128xbf16, #tpu.memory_space<vmem>>, vector<40x64xbf16>
    %c1_13 = arith.constant 1 : index
    %c0_14 = arith.constant 0 : index
    %c0_15 = arith.constant 0 : index
    %16 = vector.load %arg2[%c1_13, %c0_14, %c0_15] : memref<3x64x128xbf16, #tpu.memory_space<vmem>>, vector<1x64x128xbf16>
    %17 = vector.shape_cast %16 : vector<1x64x128xbf16> to vector<64x128xbf16>
    %cst_16 = arith.constant dense<0.000000e+00> : vector<40x128xf32>
    %18 = tpu.matmul %15, %17, %cst_16 {dimension_numbers = #tpu.dot_dimension_numbers<[1], [0], [0], [1], [0, 0, 1, 1], [], []>} : vector<40x64xbf16>, vector<64x128xbf16>, vector<40x128xf32> -> vector<40x128xf32>
    %19 = arith.addf %14, %18 : vector<40x128xf32>
    %c9 = arith.constant 9 : index
    %c0_17 = arith.constant 0 : index
    %20 = vector.load %arg12[%c9, %c0_17] : memref<56x128xbf16, #tpu.memory_space<vmem>>, vector<40x64xbf16>
    %c2 = arith.constant 2 : index
    %c0_18 = arith.constant 0 : index
    %c0_19 = arith.constant 0 : index
    %21 = vector.load %arg2[%c2, %c0_18, %c0_19] : memref<3x64x128xbf16, #tpu.memory_space<vmem>>, vector<1x64x128xbf16>
    %22 = vector.shape_cast %21 : vector<1x64x128xbf16> to vector<64x128xbf16>
    %cst_20 = arith.constant dense<0.000000e+00> : vector<40x128xf32>
    %23 = tpu.matmul %20, %22, %cst_20 {dimension_numbers = #tpu.dot_dimension_numbers<[1], [0], [0], [1], [0, 0, 1, 1], [], []>} : vector<40x64xbf16>, vector<64x128xbf16>, vector<40x128xf32> -> vector<40x128xf32>
    %24 = arith.addf %19, %23 : vector<40x128xf32>
    %c0_21 = arith.constant 0 : index
    %c0_22 = arith.constant 0 : index
    %25 = vector.load %arg3[%c0_21, %c0_22] : memref<1x128xf32, #tpu.memory_space<vmem>>, vector<1x128xf32>
    %26 = vector.broadcast %25 : vector<1x128xf32> to vector<40x128xf32>
    %27 = arith.mulf %24, %26 : vector<40x128xf32>
    %c0_23 = arith.constant 0 : index
    %c0_24 = arith.constant 0 : index
    %28 = vector.load %arg4[%c0_23, %c0_24] : memref<1x128xf32, #tpu.memory_space<vmem>>, vector<1x128xf32>
    %29 = vector.broadcast %28 : vector<1x128xf32> to vector<40x128xf32>
    %30 = arith.addf %27, %29 : vector<40x128xf32>
    %cst_25 = arith.constant 2.000000e+01 : f32
    %31 = vector.broadcast %cst_25 : f32 to vector<40x128xf32>
    %32 = arith.minimumf %30, %31 : vector<40x128xf32>
    %33 = math.exp %32 : vector<40x128xf32>
    %cst_26 = arith.constant 2.000000e+00 : f32
    %34 = vector.broadcast %cst_26 : f32 to vector<40x128xf32>
    %35 = arith.addf %33, %34 : vector<40x128xf32>
    %36 = arith.mulf %33, %35 : vector<40x128xf32>
    %cst_27 = arith.constant 2.000000e+01 : f32
    %37 = vector.broadcast %cst_27 : f32 to vector<40x128xf32>
    %38 = arith.cmpf ogt, %30, %37 : vector<40x128xf32>
    %39 = arith.mulf %30, %36 : vector<40x128xf32>
    %cst_28 = arith.constant 2.000000e+00 : f32
    %40 = vector.broadcast %cst_28 : f32 to vector<40x128xf32>
    %41 = arith.addf %36, %40 : vector<40x128xf32>
    %42 = tpu.reciprocal %41 {approx = true} : vector<40x128xf32> -> vector<40x128xf32>
    %43 = arith.mulf %39, %42 : vector<40x128xf32>
    %44 = arith.select %38, %30, %43 : vector<40x128xi1>, vector<40x128xf32>
    %45 = vector.extract_strided_slice %44 {offsets = [0, 0], sizes = [16, 128], strides = [1, 1]} : vector<40x128xf32> to vector<16x128xf32>
    %46 = arith.truncf %45 : vector<16x128xf32> to vector<16x128xbf16>
    %c8_29 = arith.constant 8 : index
    %c0_30 = arith.constant 0 : index
    %47 = vector.load %arg13[%c8_29, %c0_30] : memref<56x128xbf16, #tpu.memory_space<vmem>>, vector<16x128xbf16>
    tpu.vector_store %arg13[%c8_29, %c0_30], %46 {strides = array<i32>} : memref<56x128xbf16, #tpu.memory_space<vmem>>, vector<16x128xbf16>,
    %48 = vector.extract_strided_slice %44 {offsets = [24, 0], sizes = [16, 128], strides = [1, 1]} : vector<40x128xf32> to vector<16x128xf32>
    %49 = arith.truncf %48 : vector<16x128xf32> to vector<16x128xbf16>
    %c32_31 = arith.constant 32 : index
    %c0_32 = arith.constant 0 : index
    %50 = vector.load %arg13[%c32_31, %c0_32] : memref<56x128xbf16, #tpu.memory_space<vmem>>, vector<16x128xbf16>
    tpu.vector_store %arg13[%c32_31, %c0_32], %49 {strides = array<i32>} : memref<56x128xbf16, #tpu.memory_space<vmem>>, vector<16x128xbf16>,
    %c7_33 = arith.constant 7 : index
    %c0_34 = arith.constant 0 : index
    %51 = vector.load %arg13[%c7_33, %c0_34] : memref<56x128xbf16, #tpu.memory_space<vmem>>, vector<40x128xbf16>
    %c0_35 = arith.constant 0 : index
    %c0_36 = arith.constant 0 : index
    %c0_37 = arith.constant 0 : index
    %52 = vector.load %arg5[%c0_35, %c0_36, %c0_37] : memref<3x128x128xbf16, #tpu.memory_space<vmem>>, vector<1x128x128xbf16>
    %53 = vector.shape_cast %52 : vector<1x128x128xbf16> to vector<128x128xbf16>
    %cst_38 = arith.constant dense<0.000000e+00> : vector<40x128xf32>
    %54 = tpu.matmul %51, %53, %cst_38 {dimension_numbers = #tpu.dot_dimension_numbers<[1], [0], [0], [1], [0, 0, 1, 1], [], []>} : vector<40x128xbf16>, vector<128x128xbf16>, vector<40x128xf32> -> vector<40x128xf32>
    %c8_39 = arith.constant 8 : index
    %c0_40 = arith.constant 0 : index
    %55 = vector.load %arg13[%c8_39, %c0_40] : memref<56x128xbf16, #tpu.memory_space<vmem>>, vector<40x128xbf16>
    %c1_41 = arith.constant 1 : index
    %c0_42 = arith.constant 0 : index
    %c0_43 = arith.constant 0 : index
    %56 = vector.load %arg5[%c1_41, %c0_42, %c0_43] : memref<3x128x128xbf16, #tpu.memory_space<vmem>>, vector<1x128x128xbf16>
    %57 = vector.shape_cast %56 : vector<1x128x128xbf16> to vector<128x128xbf16>
    %cst_44 = arith.constant dense<0.000000e+00> : vector<40x128xf32>
    %58 = tpu.matmul %55, %57, %cst_44 {dimension_numbers = #tpu.dot_dimension_numbers<[1], [0], [0], [1], [0, 0, 1, 1], [], []>} : vector<40x128xbf16>, vector<128x128xbf16>, vector<40x128xf32> -> vector<40x128xf32>
    %59 = arith.addf %54, %58 : vector<40x128xf32>
    %c9_45 = arith.constant 9 : index
    %c0_46 = arith.constant 0 : index
    %60 = vector.load %arg13[%c9_45, %c0_46] : memref<56x128xbf16, #tpu.memory_space<vmem>>, vector<40x128xbf16>
    %c2_47 = arith.constant 2 : index
    %c0_48 = arith.constant 0 : index
    %c0_49 = arith.constant 0 : index
    %61 = vector.load %arg5[%c2_47, %c0_48, %c0_49] : memref<3x128x128xbf16, #tpu.memory_space<vmem>>, vector<1x128x128xbf16>
    %62 = vector.shape_cast %61 : vector<1x128x128xbf16> to vector<128x128xbf16>
    %cst_50 = arith.constant dense<0.000000e+00> : vector<40x128xf32>
    %63 = tpu.matmul %60, %62, %cst_50 {dimension_numbers = #tpu.dot_dimension_numbers<[1], [0], [0], [1], [0, 0, 1, 1], [], []>} : vector<40x128xbf16>, vector<128x128xbf16>, vector<40x128xf32> -> vector<40x128xf32>
    %64 = arith.addf %59, %63 : vector<40x128xf32>
    %c0_51 = arith.constant 0 : index
    %c0_52 = arith.constant 0 : index
    %65 = vector.load %arg6[%c0_51, %c0_52] : memref<1x128xf32, #tpu.memory_space<vmem>>, vector<1x128xf32>
    %66 = vector.broadcast %65 : vector<1x128xf32> to vector<40x128xf32>
    %67 = arith.mulf %64, %66 : vector<40x128xf32>
    %c0_53 = arith.constant 0 : index
    %c0_54 = arith.constant 0 : index
    %68 = vector.load %arg7[%c0_53, %c0_54] : memref<1x128xf32, #tpu.memory_space<vmem>>, vector<1x128xf32>
    %69 = vector.broadcast %68 : vector<1x128xf32> to vector<40x128xf32>
    %70 = arith.addf %67, %69 : vector<40x128xf32>
    %cst_55 = arith.constant 2.000000e+01 : f32
    %71 = vector.broadcast %cst_55 : f32 to vector<40x128xf32>
    %72 = arith.minimumf %70, %71 : vector<40x128xf32>
    %73 = math.exp %72 : vector<40x128xf32>
    %cst_56 = arith.constant 2.000000e+00 : f32
    %74 = vector.broadcast %cst_56 : f32 to vector<40x128xf32>
    %75 = arith.addf %73, %74 : vector<40x128xf32>
    %76 = arith.mulf %73, %75 : vector<40x128xf32>
    %cst_57 = arith.constant 2.000000e+01 : f32
    %77 = vector.broadcast %cst_57 : f32 to vector<40x128xf32>
    %78 = arith.cmpf ogt, %70, %77 : vector<40x128xf32>
    %79 = arith.mulf %70, %76 : vector<40x128xf32>
    %cst_58 = arith.constant 2.000000e+00 : f32
    %80 = vector.broadcast %cst_58 : f32 to vector<40x128xf32>
    %81 = arith.addf %76, %80 : vector<40x128xf32>
    %82 = tpu.reciprocal %81 {approx = true} : vector<40x128xf32> -> vector<40x128xf32>
    %83 = arith.mulf %79, %82 : vector<40x128xf32>
    %84 = arith.select %78, %70, %83 : vector<40x128xi1>, vector<40x128xf32>
    %85 = vector.extract_strided_slice %84 {offsets = [0, 0], sizes = [16, 128], strides = [1, 1]} : vector<40x128xf32> to vector<16x128xf32>
    %86 = arith.truncf %85 : vector<16x128xf32> to vector<16x128xbf16>
    %c8_59 = arith.constant 8 : index
    %c0_60 = arith.constant 0 : index
    %87 = vector.load %arg12[%c8_59, %c0_60] : memref<56x128xbf16, #tpu.memory_space<vmem>>, vector<16x128xbf16>
    tpu.vector_store %arg12[%c8_59, %c0_60], %86 {strides = array<i32>} : memref<56x128xbf16, #tpu.memory_space<vmem>>, vector<16x128xbf16>,
    %88 = vector.extract_strided_slice %84 {offsets = [24, 0], sizes = [16, 128], strides = [1, 1]} : vector<40x128xf32> to vector<16x128xf32>
    %89 = arith.truncf %88 : vector<16x128xf32> to vector<16x128xbf16>
    %c32_61 = arith.constant 32 : index
    %c0_62 = arith.constant 0 : index
    %90 = vector.load %arg12[%c32_61, %c0_62] : memref<56x128xbf16, #tpu.memory_space<vmem>>, vector<16x128xbf16>
    tpu.vector_store %arg12[%c32_61, %c0_62], %89 {strides = array<i32>} : memref<56x128xbf16, #tpu.memory_space<vmem>>, vector<16x128xbf16>,
    %c7_63 = arith.constant 7 : index
    %c0_64 = arith.constant 0 : index
    %91 = vector.load %arg12[%c7_63, %c0_64] : memref<56x128xbf16, #tpu.memory_space<vmem>>, vector<40x128xbf16>
    %c0_65 = arith.constant 0 : index
    %c0_66 = arith.constant 0 : index
    %c0_67 = arith.constant 0 : index
    %92 = vector.load %arg8[%c0_65, %c0_66, %c0_67] : memref<3x128x128xbf16, #tpu.memory_space<vmem>>, vector<1x128x128xbf16>
    %93 = vector.shape_cast %92 : vector<1x128x128xbf16> to vector<128x128xbf16>
    %cst_68 = arith.constant dense<0.000000e+00> : vector<40x128xf32>
    %94 = tpu.matmul %91, %93, %cst_68 {dimension_numbers = #tpu.dot_dimension_numbers<[1], [0], [0], [1], [0, 0, 1, 1], [], []>} : vector<40x128xbf16>, vector<128x128xbf16>, vector<40x128xf32> -> vector<40x128xf32>
    %c8_69 = arith.constant 8 : index
    %c0_70 = arith.constant 0 : index
    %95 = vector.load %arg12[%c8_69, %c0_70] : memref<56x128xbf16, #tpu.memory_space<vmem>>, vector<40x128xbf16>
    %c1_71 = arith.constant 1 : index
    %c0_72 = arith.constant 0 : index
    %c0_73 = arith.constant 0 : index
    %96 = vector.load %arg8[%c1_71, %c0_72, %c0_73] : memref<3x128x128xbf16, #tpu.memory_space<vmem>>, vector<1x128x128xbf16>
    %97 = vector.shape_cast %96 : vector<1x128x128xbf16> to vector<128x128xbf16>
    %cst_74 = arith.constant dense<0.000000e+00> : vector<40x128xf32>
    %98 = tpu.matmul %95, %97, %cst_74 {dimension_numbers = #tpu.dot_dimension_numbers<[1], [0], [0], [1], [0, 0, 1, 1], [], []>} : vector<40x128xbf16>, vector<128x128xbf16>, vector<40x128xf32> -> vector<40x128xf32>
    %99 = arith.addf %94, %98 : vector<40x128xf32>
    %c9_75 = arith.constant 9 : index
    %c0_76 = arith.constant 0 : index
    %100 = vector.load %arg12[%c9_75, %c0_76] : memref<56x128xbf16, #tpu.memory_space<vmem>>, vector<40x128xbf16>
    %c2_77 = arith.constant 2 : index
    %c0_78 = arith.constant 0 : index
    %c0_79 = arith.constant 0 : index
    %101 = vector.load %arg8[%c2_77, %c0_78, %c0_79] : memref<3x128x128xbf16, #tpu.memory_space<vmem>>, vector<1x128x128xbf16>
    %102 = vector.shape_cast %101 : vector<1x128x128xbf16> to vector<128x128xbf16>
    %cst_80 = arith.constant dense<0.000000e+00> : vector<40x128xf32>
    %103 = tpu.matmul %100, %102, %cst_80 {dimension_numbers = #tpu.dot_dimension_numbers<[1], [0], [0], [1], [0, 0, 1, 1], [], []>} : vector<40x128xbf16>, vector<128x128xbf16>, vector<40x128xf32> -> vector<40x128xf32>
    %104 = arith.addf %99, %103 : vector<40x128xf32>
    %c0_81 = arith.constant 0 : index
    %c0_82 = arith.constant 0 : index
    %105 = vector.load %arg9[%c0_81, %c0_82] : memref<1x128xf32, #tpu.memory_space<vmem>>, vector<1x128xf32>
    %106 = vector.broadcast %105 : vector<1x128xf32> to vector<40x128xf32>
    %107 = arith.mulf %104, %106 : vector<40x128xf32>
    %c0_83 = arith.constant 0 : index
    %c0_84 = arith.constant 0 : index
    %108 = vector.load %arg10[%c0_83, %c0_84] : memref<1x128xf32, #tpu.memory_space<vmem>>, vector<1x128xf32>
    %109 = vector.broadcast %108 : vector<1x128xf32> to vector<40x128xf32>
    %110 = arith.addf %107, %109 : vector<40x128xf32>
    %cst_85 = arith.constant 2.000000e+01 : f32
    %111 = vector.broadcast %cst_85 : f32 to vector<40x128xf32>
    %112 = arith.minimumf %110, %111 : vector<40x128xf32>
    %113 = math.exp %112 : vector<40x128xf32>
    %cst_86 = arith.constant 2.000000e+00 : f32
    %114 = vector.broadcast %cst_86 : f32 to vector<40x128xf32>
    %115 = arith.addf %113, %114 : vector<40x128xf32>
    %116 = arith.mulf %113, %115 : vector<40x128xf32>
    %cst_87 = arith.constant 2.000000e+01 : f32
    %117 = vector.broadcast %cst_87 : f32 to vector<40x128xf32>
    %118 = arith.cmpf ogt, %110, %117 : vector<40x128xf32>
    %119 = arith.mulf %110, %116 : vector<40x128xf32>
    %cst_88 = arith.constant 2.000000e+00 : f32
    %120 = vector.broadcast %cst_88 : f32 to vector<40x128xf32>
    %121 = arith.addf %116, %120 : vector<40x128xf32>
    %122 = tpu.reciprocal %121 {approx = true} : vector<40x128xf32> -> vector<40x128xf32>
    %123 = arith.mulf %119, %122 : vector<40x128xf32>
    %124 = arith.select %118, %110, %123 : vector<40x128xi1>, vector<40x128xf32>
    %125 = vector.extract_strided_slice %124 {offsets = [0, 0], sizes = [16, 128], strides = [1, 1]} : vector<40x128xf32> to vector<16x128xf32>
    %c0_89 = arith.constant 0 : index
    %c0_90 = arith.constant 0 : index
    %c0_91 = arith.constant 0 : index
    %126 = vector.load %arg11[%c0_89, %c0_90, %c0_91] : memref<2x16x128xf32, #tpu.memory_space<vmem>>, vector<1x16x128xf32>
    %127 = vector.shape_cast %126 : vector<1x16x128xf32> to vector<16x128xf32>
    %128 = vector.shape_cast %125 : vector<16x128xf32> to vector<1x16x128xf32>
    tpu.vector_store %arg11[%c0_89, %c0_90, %c0_91], %128 {strides = array<i32>} : memref<2x16x128xf32, #tpu.memory_space<vmem>>, vector<1x16x128xf32>,
    %129 = vector.extract_strided_slice %124 {offsets = [24, 0], sizes = [16, 128], strides = [1, 1]} : vector<40x128xf32> to vector<16x128xf32>
    %c1_92 = arith.constant 1 : index
    %c0_93 = arith.constant 0 : index
    %c0_94 = arith.constant 0 : index
    %130 = vector.load %arg11[%c1_92, %c0_93, %c0_94] : memref<2x16x128xf32, #tpu.memory_space<vmem>>, vector<1x16x128xf32>
    %131 = vector.shape_cast %130 : vector<1x16x128xf32> to vector<16x128xf32>
    %132 = vector.shape_cast %129 : vector<16x128xf32> to vector<1x16x128xf32>
    tpu.vector_store %arg11[%c1_92, %c0_93, %c0_94], %132 {strides = array<i32>} : memref<2x16x128xf32, #tpu.memory_space<vmem>>, vector<1x16x128xf32>,
    return
  }
  func.func @transform_0(%arg0: i32) -> (i32, i32, i32) {
    %c0_i32 = arith.constant 0 : i32
    %c0_i32_0 = arith.constant 0 : i32
    %c0_i32_1 = arith.constant 0 : i32
    return %arg0, %c0_i32, %c0_i32_0 : i32, i32, i32
  }
  func.func @transform_1(%arg0: i32) -> (i32, i32, i32) {
    %c0_i32 = arith.constant 0 : i32
    %c0_i32_0 = arith.constant 0 : i32
    %c0_i32_1 = arith.constant 0 : i32
    %c0_i32_2 = arith.constant 0 : i32
    return %c0_i32, %c0_i32_0, %c0_i32_1 : i32, i32, i32
  }
  func.func @transform_2(%arg0: i32) -> (i32, i32) {
    %c0_i32 = arith.constant 0 : i32
    %c0_i32_0 = arith.constant 0 : i32
    %c0_i32_1 = arith.constant 0 : i32
    return %c0_i32, %c0_i32_0 : i32, i32
  }
  func.func @transform_3(%arg0: i32) -> (i32, i32) {
    %c0_i32 = arith.constant 0 : i32
    %c0_i32_0 = arith.constant 0 : i32
    %c0_i32_1 = arith.constant 0 : i32
    return %c0_i32, %c0_i32_0 : i32, i32
  }
  func.func @transform_4(%arg0: i32) -> (i32, i32, i32) {
    %c0_i32 = arith.constant 0 : i32
    %c0_i32_0 = arith.constant 0 : i32
    %c0_i32_1 = arith.constant 0 : i32
    %c0_i32_2 = arith.constant 0 : i32
    return %c0_i32, %c0_i32_0, %c0_i32_1 : i32, i32, i32
  }
  func.func @transform_5(%arg0: i32) -> (i32, i32) {
    %c0_i32 = arith.constant 0 : i32
    %c0_i32_0 = arith.constant 0 : i32
    %c0_i32_1 = arith.constant 0 : i32
    return %c0_i32, %c0_i32_0 : i32, i32
  }
  func.func @transform_6(%arg0: i32) -> (i32, i32) {
    %c0_i32 = arith.constant 0 : i32
    %c0_i32_0 = arith.constant 0 : i32
    %c0_i32_1 = arith.constant 0 : i32
    return %c0_i32, %c0_i32_0 : i32, i32
  }
  func.func @transform_7(%arg0: i32) -> (i32, i32, i32) {
    %c0_i32 = arith.constant 0 : i32
    %c0_i32_0 = arith.constant 0 : i32
    %c0_i32_1 = arith.constant 0 : i32
    %c0_i32_2 = arith.constant 0 : i32
    return %c0_i32, %c0_i32_0, %c0_i32_1 : i32, i32, i32
  }
  func.func @transform_8(%arg0: i32) -> (i32, i32) {
    %c0_i32 = arith.constant 0 : i32
    %c0_i32_0 = arith.constant 0 : i32
    %c0_i32_1 = arith.constant 0 : i32
    return %c0_i32, %c0_i32_0 : i32, i32
  }
  func.func @transform_9(%arg0: i32) -> (i32, i32) {
    %c0_i32 = arith.constant 0 : i32
    %c0_i32_0 = arith.constant 0 : i32
    %c0_i32_1 = arith.constant 0 : i32
    return %c0_i32, %c0_i32_0 : i32, i32
  }
  func.func @transform_10(%arg0: i32) -> (i32, i32, i32) {
    %c0_i32 = arith.constant 0 : i32
    %c0_i32_0 = arith.constant 0 : i32
    %c0_i32_1 = arith.constant 0 : i32
    return %arg0, %c0_i32, %c0_i32_0 : i32, i32, i32
  }
}

</mosaic_0001>

<bundles_post_ra>
// kernel: _block_forward.1
= control target key start
LH: loop header
LB: loop body
LE: loop exit
PB: predicated region body
PF: predicated region fallthrough
CT: control target
= control target key end

     0   :  { %15 = vsyncpa [#allocation5], 0  ;;  %s2413_s13 = smov [#allocation4]   ;;  %s2821_s0 = inlined_call_operand.vmem [shape: f32[2,16,64], index: 0, kind: input, shape index: {}]   ;;  %s2822_s1 = inlined_call_operand.hbm [shape: bf16[3,64,128], index: 1, kind: input, shape index: {}]   ;;  %s2823_s2 = inlined_call_operand.vmem [shape: f32[1,128], index: 2, kind: input, shape index: {}]   ;;  %s2824_s3 = inlined_call_operand.vmem [shape: f32[1,128], index: 3, kind: input, shape index: {}]   ;;  %s2825_s4 = inlined_call_operand.vmem [shape: bf16[3,128,128], index: 4, kind: input, shape index: {}]   ;;  %s2826_s5 = inlined_call_operand.vmem [shape: f32[1,128], index: 5, kind: input, shape index: {}]   ;;  %s2827_s6 = inlined_call_operand.vmem [shape: f32[1,128], index: 6, kind: input, shape index: {}]   ;;  %s2828_s7 = inlined_call_operand.vmem [shape: bf16[3,128,128], index: 7, kind: input, shape index: {}]   ;;  %s2829_s8 = inlined_call_operand.vmem [shape: f32[1,128], index: 8, kind: input, shape index: {}]   ;;  %s2830_s9 = inlined_call_operand.vmem [shape: f32[1,128], index: 9, kind: input, shape index: {}]   ;;  %s2831_s10 = inlined_call_operand.vmem [shape: f32[2,16,128], index: 10, kind: output, shape index: {}]  }
   0x1   :  { %s23_s14 = sshll.u32 %s2413_s13, 4  ;;  %s2389_s17 = scalar_lea.hbm %s2822_s1, 1536  ;;  %s24_s14 = int_to_ptr.vmem [resolvable:$true] %s23_s14 }
   0x2   :  { %p2390_p0 = scmp.ne.s32.totalorder %s2822_s1, %s2389_s17  ;;  %p2393_p1 = scmp.lt.u32.totalorder %s2389_s17, %s2822_s1 }
   0x4   :  { %p2395_p2 = pnand %p2393_p1, %p2390_p0 }
   0x6   :  { %2398 = shalt.err (!%p2395_p2)
}
   0x7   :  { %s2399_s22 = scalar_lea.vmem %s24_s14, 1536  ;;  %p2404_p4 = scmp.lt.s32.totalorder %s24_s14, %s24_s14 }
   0x8   :  { %p2400_p3 = scmp.ne.s32.totalorder %s24_s14, %s2399_s22  ;;  %p2405_p5 = scmp.lt.s32.totalorder %s2399_s22, %s2399_s22 }
   0xa   :  { %p2406_p6 = por %p2405_p5, %p2404_p4 }
   0xc   :  { %p2407_p7 = pnand %p2406_p6, %p2400_p3 }
   0xe   :  { %2410 = shalt.err (!%p2407_p7)
}
   0xf   :  { %s2414_s23 = smov 64   ;;  %s2415_s24 = smov 4  }
  0x10   :  { %29 = dma.hbm_to_vmem [thread:$0]  %s2822_s1, 1536, %s24_s14, [#allocation5], %s2414_s23, %s2414_s23, %s2415_s24  }
  0x11   :  { %2411 = dma.done.wait [#allocation5], 1536  }
  0x12   :  { %2412 = vsyncadd [#allocation5], 4294965760  ;;  %v2416_v0 = vmov 0.0   ;;  %vm2417_vm0 = vmmov 0   ;;  %v2418_v1 = vmov 0   ;;  %v2256_v2 = vld [vmem:[#allocation4 + $0x20] sm:$0xff]  }
  0x13   :  { %1958 = vmatprep.subr.bf16.mxu0 %v2416_v0  ;;  %1966 = vmatprep.mubr.msk.bf16.mxu0 %vm2417_vm0, %v2416_v0  ;;  %54 = vst [vmem:[#allocation2] sm:$0xf] %v2418_v1  ;;  %55 = vst [vmem:[#allocation2 + $0x4] sm:$0xf] %v2418_v1  ;;  %v2257_v3 = vld [vmem:[#allocation4 + $0x28] sm:$0xff]   ;;  %v69_v5 = vld [vmem:[%s2821_s0 + $0x8] sm:$0xff] }
  0x14   :  { %56 = vst [vmem:[#allocation2 + $0x8] sm:$0xf] %v2418_v1  ;;  %57 = vst [vmem:[#allocation2 + $0xc] sm:$0xf] %v2418_v1  ;;  %2018 = vmatprep.subr.bf16.mxu1 %v2416_v0  ;;  %2034 = vmatprep.mubr.msk.bf16.mxu1 %vm2417_vm0, %v2416_v0  ;;  %v68_v4 = vld [vmem:[%s2821_s0] sm:$0xff]  ;;  %vm78_vm1 = vcmask 519168   ;;  %v1848_v7 = vpack.c.bf16 %v69_v5, %v69_v5 }
  0x15   :  { %58 = vst [vmem:[#allocation2 + $0x10] sm:$0xf] %v2418_v1  ;;  %59 = vst [vmem:[#allocation2 + $0x14] sm:$0xf] %v2418_v1  ;;  %1959 = vmatpush3.bf16.msra.mxu0 %v2256_v2  ;;  %v1847_v6 = vpack.c.bf16 %v68_v4, %v68_v4  ;;  %v2258_v8 = vld [vmem:[#allocation4 + $0x30] sm:$0xff]   ;;  %v1667_v9 = vld [vmem:[%s2821_s0 + $0x10] sm:$0xff] }
  0x16   :  { %60 = vst [vmem:[#allocation2 + $0x18] sm:$0xf] %v2418_v1  ;;  %61 = vst [vmem:[#allocation3] sm:$0xf] %v2418_v1  ;;  %1960 = vmatprep.subr.bf16.mxu0 %v2416_v0  ;;  %v1849_v10 = vpack.c.bf16 %v1667_v9, %v1667_v9  ;;  %v1668_v11 = vld [vmem:[%s2821_s0 + $0x18] sm:$0xff]  ;;  %v2259_v13 = vld [vmem:[#allocation4 + $0x38] sm:$0xff]  }
  0x17   :  { %62 = vst [vmem:[#allocation3 + $0x4] sm:$0xf] %v2418_v1  ;;  %63 = vst [vmem:[#allocation3 + $0x8] sm:$0xf] %v2418_v1  ;;  %v1850_v12 = vpack.c.bf16 %v1668_v11, %v1668_v11  ;;  %vm154_vm2 = vcmask 523264   ;;  %v2262_v15 = vld [vmem:[#allocation4] sm:$0xff]  }
  0x18   :  { %64 = vst [vmem:[#allocation3 + $0xc] sm:$0xf] %v2418_v1  ;;  %65 = vst [vmem:[#allocation3 + $0x10] sm:$0xf] %v2418_v1  ;;  %v2263_v23 = vld [vmem:[#allocation4 + $0x8] sm:$0xff]   ;;  %v2265_v34 = vld [vmem:[#allocation4 + $0x10] sm:$0xff]  }
  0x19   :  { %66 = vst [vmem:[#allocation3 + $0x14] sm:$0xf] %v2418_v1  ;;  %67 = vst [vmem:[#allocation3 + $0x18] sm:$0xf] %v2418_v1  ;;  %1961 = vmatpush3.bf16.msra.mxu0 %v2257_v3  ;;  %v2267_v42 = vld [vmem:[#allocation4 + $0x18] sm:$0xff]   ;;  %v2268_v50 = vld [vmem:[#allocation4 + $0x40] sm:$0xff]  }
  0x1a   :  { %1962 = vmatprep.subr.bf16.mxu0 %v2416_v0  ;;  %79 = vst.msk [vmem:[#allocation2 + $0x4] sm:$0xf] %vm78_vm1, %v1847_v6  ;;  %80 = vst.msk [vmem:[#allocation2 + $0x8] sm:$0xf] %vm78_vm1, %v1848_v7  ;;  %v94_v14 = vld [vmem:[#allocation2] sm:$0x8] }
  0x1b   :  { %92 = vst.msk [vmem:[#allocation2 + $0x10] sm:$0xf] %vm78_vm1, %v1849_v10  ;;  %93 = vst.msk [vmem:[#allocation2 + $0x14] sm:$0xf] %vm78_vm1, %v1850_v12  ;;  %v97_v16 = vld [vmem:[#allocation2 + $0xc] sm:$0xf] }
  0x1c   :  { %vm224_vm3 = vsmask.f32 4352  ;;  %v2269_v52 = vld [vmem:[#allocation4 + $0x48] sm:$0xff]   ;;  %v2270_v54 = vld [vmem:[#allocation4 + $0x50] sm:$0xff]   ;;  %v2271_v56 = vld [vmem:[#allocation4 + $0x58] sm:$0xff]  }
  0x1d   :  { %1963 = vmatpush3.bf16.msra.mxu0 %v2258_v8  ;;  %vm369_vm4 = vsmask.f32 7424  ;;  %v2275_v5 = vld [vmem:[%s2825_s4 + $0x40] sm:$0xff]   ;;  %v2276_v6 = vld [vmem:[%s2825_s4 + $0x48] sm:$0xff]   ;;  %v2277_v7 = vld [vmem:[%s2825_s4 + $0x50] sm:$0xff]  }
  0x1e   :  { %1964 = vmatprep.subr.bf16.mxu0 %v2416_v0  ;;  %2019 = vmatpush3.bf16.msra.mxu1 %v2275_v5  ;;  %v2278_v8 = vld [vmem:[%s2825_s4 + $0x58] sm:$0xff]   ;;  %v2279_v9 = vld [vmem:[%s2825_s4 + $0x60] sm:$0xff]   ;;  %v2280_v10 = vld [vmem:[%s2825_s4 + $0x68] sm:$0xff]  }
  0x1f   :  { %2020 = vmatprep.subr.bf16.mxu1 %v2416_v0  ;;  %v2281_v11 = vld [vmem:[%s2825_s4 + $0x70] sm:$0xff]   ;;  %v2282_v12 = vld [vmem:[%s2825_s4 + $0x78] sm:$0xff]  }
  0x21   :  { %1965 = vmatpush3.bf16.msra.mxu0 %v2259_v13  ;;  %v95_v17 = vld [vmem:[#allocation2 + $0x4] sm:$0xf]  ;;  %v96_v18 = vld [vmem:[#allocation2 + $0x8] sm:$0xf]  ;;  %v1701_v13 = vld [vmem:[%s2823_s2] ss:$0 sm:$0xff] }
  0x22   :  { %v1671_v19 = vcombine.low %v95_v17, %v96_v18  ;;  %v1681_v20 = vcombine.low %v94_v14, %v95_v17  ;;  %1978 = vmatprep.subr.bf16.mxu0 %v2416_v0  ;;  %v1682_v21 = vcombine.low %v96_v18, %v97_v16  ;;  %v2512_v22 = vld [vmem:[#allocation2 + $0x4] sm:$0xff]   ;;  %v98_v26 = vld [vmem:[#allocation2 + $0x10] sm:$0xf]  ;;  %v99_v29 = vld [vmem:[#allocation2 + $0x14] sm:$0xf]  ;;  %2021 = vmatpush3.bf16.msra.mxu1 %v2276_v6 }
  0x23   :  { %v1683_v30 = vcombine.low %v98_v26, %v99_v29  ;;  %v2273_v31 = vld [vmem:[#allocation2 + $0xc] sm:$0xff]   ;;  %v373_v32 = vshll.u32 %v2512_v22, 16  ;;  %v1672_v33 = vcombine.low %v97_v16, %v98_v26  ;;  %v371_v35 = vshrl.u32 %v2512_v22, 16  ;;  %v2274_v59 = vld [vmem:[#allocation2 + $0x14] sm:$0x1f]   ;;  %2022 = vmatprep.subr.bf16.mxu1 %v2416_v0 }
  0x24   :  { %1967 = vmatmul.mubr.msk.bf16.vlgmr.msra.gmra.mrb[0].mxu0 %vm154_vm2, %v1671_v19  ;;  %v226_v24 = vshrl.u32 %v1681_v20, 16  ;;  %v229_v25 = vshll.u32 %v1681_v20, 16  ;;  %v234_v27 = vshrl.u32 %v1682_v21, 16  ;;  %v237_v28 = vshll.u32 %v1682_v21, 16 }
  0x25   :  { %1979 = vmatpush3.bf16.msra.mxu0 %v2262_v15  ;;  %1970 = vmatprep.mubr.msk.bf16.mxu0 %vm2417_vm0, %v2416_v0  ;;  %v243_v38 = vshrl.u32 %v1683_v30, 16  ;;  %v246_v39 = vshll.u32 %v1683_v30, 16  ;;  %v375_v43 = vrot.slane %v373_v32, 1  ;;  %v378_v44 = vshll.u32 %v2273_v31, 16  ;;  %v1702_v15 = vld [vmem:[%s2824_s3] ss:$0 sm:$0xff] }
  0x26   :  { %1980 = vmatprep.subr.bf16.mxu0 %v2416_v0  ;;  %v228_v36 = vrot.slane %v226_v24, 3  ;;  %v231_v37 = vrot.slane %v229_v25, 4  ;;  %v236_v40 = vrot.slane %v234_v27, 3  ;;  %v239_v41 = vrot.slane %v237_v28, 4  ;;  %2023 = vmatpush3.bf16.msra.mxu1 %v2277_v7 }
  0x27   :  { %v245_v45 = vrot.slane %v243_v38, 3  ;;  %v248_v46 = vrot.slane %v246_v39, 4  ;;  %v1673_v47 = vcombine.low %v99_v29, %v99_v29  ;;  %v376_v57 = vor.u32 %v375_v43, %v371_v35  ;;  %2024 = vmatprep.subr.bf16.mxu1 %v2416_v0 }
  0x28   :  { %v232_v48 = vor.u32 %v231_v37, %v228_v36  ;;  %v240_v49 = vor.u32 %v239_v41, %v236_v40  ;;  %v380_v58 = vrot.slane %v378_v44, 1  ;;  %v382_v61 = vshrl.u32 %v2273_v31, 16 }
  0x29   :  { %1981 = vmatpush3.bf16.msra.mxu0 %v2263_v23  ;;  %v249_v53 = vor.u32 %v248_v46, %v245_v45  ;;  %v386_v62 = vshll.u32 %v2274_v59, 16  ;;  %v390_v3 = vshrl.u32 %v2274_v59, 16 }
  0x2a   :  { %1982 = vmatprep.subr.bf16.mxu0 %v2416_v0  ;;  %v241_v51 = vsel %vm224_vm3, %v232_v48, %v240_v49  ;;  %v381_v60 = vsel %vm369_vm4, %v376_v57, %v380_v58  ;;  %v384_v63 = vor.u32 %v382_v61, %v380_v58  ;;  %2025 = vmatpush3.bf16.msra.mxu1 %v2278_v8  ;;  %v2285_v8 = vld [vmem:[%s2825_s4] sm:$0xff]  }
  0x2b   :  { %v250_v55 = vsel %vm224_vm3, %v240_v49, %v249_v53  ;;  %v388_v1 = vrot.slane %v386_v62, 1  ;;  %2026 = vmatprep.subr.bf16.mxu1 %v2416_v0 }
  0x2c   :  { %1971 = vmatmul.mubr.msk.bf16.gmra.mrb[4].mxu0 %vm154_vm2, %v1672_v33 }
  0x2d   :  { %1983 = vmatpush3.bf16.msra.mxu0 %v2265_v34  ;;  %1974 = vmatprep.mubr.msk.bf16.mxu0 %vm2417_vm0, %v2416_v0  ;;  %v389_v2 = vsel %vm369_vm4, %v384_v63, %v388_v1  ;;  %v392_v4 = vor.u32 %v390_v3, %v388_v1 }
  0x2e   :  { %1984 = vmatprep.subr.bf16.mxu0 %v2416_v0  ;;  %2027 = vmatpush3.bf16.msra.mxu1 %v2279_v9 }
  0x2f   :  { %2028 = vmatprep.subr.bf16.mxu1 %v2416_v0 }
  0x31   :  { %1985 = vmatpush3.bf16.msra.mxu0 %v2267_v42 }
  0x32   :  { %1998 = vmatprep.subr.bf16.mxu0 %v2416_v0  ;;  %2029 = vmatpush3.bf16.msra.mxu1 %v2280_v10 }
  0x33   :  { %2030 = vmatprep.subr.bf16.mxu1 %v2416_v0 }
  0x34   :  { %1975 = vmatmul.mubr.msk.bf16.gmra.mrb[8].mxu0 %vm154_vm2, %v1673_v47 }
  0x35   :  { %1986 = vmatprep.mubr.msk.bf16.mxu0 %vm2417_vm0, %v2416_v0 }
  0x36   :  { %2031 = vmatpush3.bf16.msra.mxu1 %v2281_v11 }
  0x37   :  { %2032 = vmatprep.subr.bf16.mxu1 %v2416_v0 }
  0x3a   :  { %2033 = vmatpush3.bf16.msra.mxu1 %v2282_v12 }
  0x3b   :  { %2046 = vmatprep.subr.bf16.mxu1 %v2416_v0 }
  0x3c   :  { %1987 = vmatmul.mubr.msk.bf16.vlgmr.msra.gmra.mrb[0].mxu0 %vm154_vm2, %v241_v51 }
  0x3d   :  { %1999 = vmatpush3.bf16.msra.mxu0 %v2268_v50  ;;  %1990 = vmatprep.mubr.msk.bf16.mxu0 %vm2417_vm0, %v2416_v0 }
  0x3e   :  { %2000 = vmatprep.subr.bf16.mxu0 %v2416_v0 }
  0x41   :  { %2001 = vmatpush3.bf16.msra.mxu0 %v2269_v52 }
  0x42   :  { %2002 = vmatprep.subr.bf16.mxu0 %v2416_v0 }
  0x44   :  { %1991 = vmatmul.mubr.msk.bf16.gmra.mrb[4].mxu0 %vm154_vm2, %v250_v55 }
  0x45   :  { %2003 = vmatpush3.bf16.msra.mxu0 %v2270_v54  ;;  %1994 = vmatprep.mubr.msk.bf16.mxu0 %vm2417_vm0, %v2416_v0 }
  0x46   :  { %2004 = vmatprep.subr.bf16.mxu0 %v2416_v0 }
  0x49   :  { %2005 = vmatpush3.bf16.msra.mxu0 %v2271_v56 }
  0x4a   :  { %2130 = vmatprep.subr.bf16.mxu0 %v2416_v0 }
  0x4c   :  { %1995 = vmatmul.mubr.msk.bf16.gmra.mrb[8].mxu0 %vm154_vm2, %v249_v53 }
  0x4d   :  { %2006 = vmatprep.mubr.msk.bf16.mxu0 %vm2417_vm0, %v2416_v0 }
  0x54   :  { %2007 = vmatmul.mubr.msk.bf16.vlgmr.msra.gmra.mrb[0].mxu0 %vm154_vm2, %v381_v60 }
  0x55   :  { %2010 = vmatprep.mubr.msk.bf16.mxu0 %vm2417_vm0, %v2416_v0 }
  0x5c   :  { %2011 = vmatmul.mubr.msk.bf16.gmra.mrb[4].mxu0 %vm154_vm2, %v389_v2 }
  0x5d   :  { %2014 = vmatprep.mubr.msk.bf16.mxu0 %vm2417_vm0, %v2416_v0 }
  0x64   :  { %2015 = vmatmul.mubr.msk.bf16.gmra.mrb[8].mxu0 %vm154_vm2, %v392_v4 }
  0x65   :  { %2146 = vmatprep.mubr.msk.bf16.mxu0 %vm2417_vm0, %v2416_v0 }
 0x127   :  { %v460_v14 = vpop.f32.mrb[0].mxu0 }
 0x128   :  { %v492_v16 = vmul.f32 %v1701_v13, %v460_v14  ;;  %v2008_v17 = vpop.f32.mrb[1].mxu0 }
 0x129   :  { %v463_v18 = vpop.f32.mrb[2].mxu0 }
 0x12a   :  { %v503_v19 = vadd.f32 %v1702_v15, %v492_v16  ;;  %v493_v20 = vmul.f32 %v1701_v13, %v463_v18  ;;  %v2009_v21 = vpop.f32.mrb[3].mxu0  ;;  %v2286_v18 = vld [vmem:[%s2825_s4 + $0x8] sm:$0xff]  }
 0x12b   :  { %v2288_v21 = vld [vmem:[%s2825_s4 + $0x18] sm:$0xff]  }
 0x12c   :  { %v507_v22 = vmin.f32 %v503_v19, 20.0  ;;  %v504_v23 = vadd.f32 %v1702_v15, %v493_v20  ;;  %vm527_vm5 = vcmp.gt.f32.partialorder %v503_v19, 20.0  ;;  %v2287_v20 = vld [vmem:[%s2825_s4 + $0x10] sm:$0xff]  }
 0x12e   :  { %v511_v24 = vmul.f32 1.442695, %v507_v22  ;;  %v508_v25 = vmin.f32 %v504_v23, 20.0  ;;  %vm528_vm6 = vcmp.gt.f32.partialorder %v504_v23, 20.0  ;;  %v574_v22 = vld [vmem:[#allocation3 + $0xc] sm:$0xf] }
 0x12f   :  { %v468_v26 = vpop.f32.mrb[4].mxu0 }
 0x130   :  { %2341 = vpow2.f32 %v511_v24  ;;  %v513_v27 = vmul.f32 1.442695, %v508_v25  ;;  %v2012_v28 = vpop.f32.mrb[5].mxu0  ;;  %v2291_v25 = vld [vmem:[%s2825_s4 + $0x20] sm:$0xff]   ;;  %v571_v26 = vld [vmem:[#allocation3] sm:$0x8] }
 0x131   :  { %v470_v29 = vpop.f32.mrb[6].mxu0 }
 0x132   :  { %2343 = vpow2.f32 %v513_v27  ;;  %v494_v30 = vmul.f32 %v1701_v13, %v470_v29  ;;  %v2013_v31 = vpop.f32.mrb[7].mxu0  ;;  %v2292_v29 = vld [vmem:[%s2825_s4 + $0x28] sm:$0xff]  }
 0x134   :  { %v505_v32 = vadd.f32 %v1702_v15, %v494_v30 }
 0x136   :  { %v509_v33 = vmin.f32 %v505_v32, 20.0  ;;  %vm529_vm7 = vcmp.gt.f32.partialorder %v505_v32, 20.0 }
 0x137   :  { %v475_v34 = vpop.f32.mrb[8].mxu0 }
 0x138   :  { %v515_v35 = vmul.f32 1.442695, %v509_v33  ;;  %v495_v36 = vmul.f32 %v1701_v13, %v475_v34  ;;  %v2016_v37 = vpop.f32.mrb[9].mxu0 }
 0x139   :  { %v478_v38 = vpop.f32.mrb[10].mxu0 }
 0x13a   :  { %v2342_v39 = vpop.eup %2341  ;;  %2345 = vpow2.f32 %v515_v35  ;;  %v506_v40 = vadd.f32 %v1702_v15, %v495_v36  ;;  %v2017_v41 = vpop.f32.mrb[11].mxu0  ;;  %v2295_v36 = vld [vmem:[%s2825_s4 + $0x30] sm:$0xff]  }
 0x13b   :  { %v519_v42 = vadd.f32 2.0, %v2342_v39 }
 0x13c   :  { %v2344_v43 = vpop.eup %2343  ;;  %v510_v44 = vmin.f32 %v506_v40, 20.0  ;;  %vm530_vm8 = vcmp.gt.f32.partialorder %v506_v40, 20.0 }
 0x13d   :  { %v523_v45 = vmul.f32 %v2342_v39, %v519_v42  ;;  %v520_v46 = vadd.f32 2.0, %v2344_v43  ;;  %v2296_v42 = vld [vmem:[%s2825_s4 + $0x38] sm:$0xff]  }
 0x13e   :  { %v517_v47 = vmul.f32 1.442695, %v510_v44 }
 0x13f   :  { %v535_v48 = vadd.f32 2.0, %v523_v45  ;;  %v524_v49 = vmul.f32 %v2344_v43, %v520_v46  ;;  %v531_v56 = vmul.f32 %v523_v45, %v503_v19 }
 0x140   :  { %2347 = vpow2.f32 %v517_v47  ;;  %v2297_v47 = vld [vmem:[%s2825_s4 + $0x80] sm:$0xff]  }
 0x141   :  { %2349 = vrcp.f32 %v535_v48  ;;  %v536_v50 = vadd.f32 2.0, %v524_v49  ;;  %v532_v60 = vmul.f32 %v524_v49, %v504_v23 }
 0x143   :  { %2351 = vrcp.f32 %v536_v50 }
 0x144   :  { %v2346_v51 = vpop.eup %2345 }
 0x145   :  { %v521_v52 = vadd.f32 2.0, %v2346_v51 }
 0x147   :  { %v525_v53 = vmul.f32 %v2346_v51, %v521_v52  ;;  %v2298_v51 = vld [vmem:[%s2825_s4 + $0x88] sm:$0xff]  }
 0x149   :  { %v537_v54 = vadd.f32 2.0, %v525_v53  ;;  %v533_v7 = vmul.f32 %v525_v53, %v505_v32  ;;  %v2299_v53 = vld [vmem:[%s2825_s4 + $0x90] sm:$0xff]  }
 0x14a   :  { %v2348_v55 = vpop.eup %2347 }
 0x14b   :  { %v2350_v57 = vpop.eup %2349  ;;  %v522_v58 = vadd.f32 2.0, %v2348_v55  ;;  %2353 = vrcp.f32 %v537_v54 }
 0x14c   :  { %v543_v59 = vmul.f32 %v2350_v57, %v531_v56  ;;  %v2301_v56 = vld [vmem:[%s2825_s4 + $0xa0] sm:$0xff]   ;;  %v2302_v57 = vld [vmem:[%s2825_s4 + $0xa8] sm:$0xff]  }
 0x14d   :  { %v2352_v61 = vpop.eup %2351  ;;  %v526_v62 = vmul.f32 %v2348_v55, %v522_v58  ;;  %v2300_v55 = vld [vmem:[%s2825_s4 + $0x98] sm:$0xff]  }
 0x14e   :  { %v547_v63 = vsel %vm527_vm5, %v503_v19, %v543_v59  ;;  %v544_v1 = vmul.f32 %v2352_v61, %v532_v60  ;;  %v2303_v60 = vld [vmem:[%s2825_s4 + $0xb0] sm:$0xff]  }
 0x14f   :  { %v1851_v2 = vpack.c.bf16 %v547_v63, %v547_v63  ;;  %v538_v3 = vadd.f32 2.0, %v526_v62  ;;  %v534_v10 = vmul.f32 %v526_v62, %v506_v40  ;;  %v2304_v63 = vld [vmem:[%s2825_s4 + $0xb8] sm:$0xff]  }
 0x150   :  { %v548_v4 = vsel %vm528_vm6, %v504_v23, %v544_v1 }
 0x151   :  { %559 = vst [vmem:[#allocation3 + $0x4] sm:$0xf] %v1851_v2  ;;  %v1852_v5 = vpack.c.bf16 %v548_v4, %v548_v4  ;;  %2355 = vrcp.f32 %v538_v3 }
 0x153   :  { %560 = vst [vmem:[#allocation3 + $0x8] sm:$0xf] %v1852_v5 }
 0x155   :  { %v2354_v6 = vpop.eup %2353 }
 0x156   :  { %v545_v9 = vmul.f32 %v2354_v6, %v533_v7 }
 0x158   :  { %v572_v11 = vld [vmem:[#allocation3 + $0x4] sm:$0xf]  ;;  %v549_v16 = vsel %vm529_vm7, %v505_v32, %v545_v9 }
 0x159   :  { %v1734_v28 = vcombine.low %v571_v26, %v572_v11  ;;  %v2320_v26 = vld [vmem:[%s2828_s7 + $0x28] sm:$0xff]  }
 0x15a   :  { %v573_v12 = vld [vmem:[#allocation3 + $0x8] sm:$0xf] }
 0x15b   :  { %v2356_v13 = vpop.eup %2355  ;;  %v1723_v14 = vcombine.low %v572_v11, %v573_v12  ;;  %v1735_v27 = vcombine.low %v573_v12, %v574_v22  ;;  %v735_v34 = vshrl.u32 %v1734_v28, 16  ;;  %v738_v35 = vshll.u32 %v1734_v28, 16  ;;  %v2305_v58 = vld [vmem:[#allocation3 + $0x4] sm:$0xff]   ;;  %v2322_v28 = vld [vmem:[%s2828_s7 + $0x30] sm:$0xff]  }
 0x15c   :  { %v546_v15 = vmul.f32 %v2356_v13, %v534_v10  ;;  %v907_v61 = vshll.u32 %v2305_v58, 16  ;;  %v905_v2 = vshrl.u32 %v2305_v58, 16 }
 0x15d   :  { %2035 = vmatmul.mubr.bf16.vlgmr.msra.gmra.mrb[0].mxu1 %v1723_v14  ;;  %v743_v31 = vshrl.u32 %v1735_v27, 16  ;;  %v746_v32 = vshll.u32 %v1735_v27, 16  ;;  %v740_v41 = vrot.slane %v738_v35, 4  ;;  %v2308_v14 = vld [vmem:[%s2828_s7 + $0x40] sm:$0xff]   ;;  %v2321_v27 = vld [vmem:[%s2828_s7 + $0x78] sm:$0xff]  }
 0x15e   :  { %v550_v17 = vsel %vm530_vm8, %v506_v40, %v546_v15  ;;  %2047 = vmatpush3.bf16.msra.mxu1 %v2285_v8  ;;  %2038 = vmatprep.mubr.msk.bf16.mxu1 %vm2417_vm0, %v2416_v0  ;;  %v737_v40 = vrot.slane %v735_v34, 3  ;;  %v909_v1 = vrot.slane %v907_v61, 1  ;;  %v2309_v15 = vld [vmem:[%s2828_s7 + $0x48] sm:$0xff]  }
 0x15f   :  { %v1862_v19 = vpack.c.bf16 %v550_v17, %v549_v16  ;;  %2048 = vmatprep.subr.bf16.mxu1 %v2416_v0  ;;  %v745_v37 = vrot.slane %v743_v31, 3  ;;  %v748_v38 = vrot.slane %v746_v32, 4  ;;  %v2310_v16 = vld [vmem:[%s2828_s7] sm:$0xff]   ;;  %v2311_v17 = vld [vmem:[%s2828_s7 + $0x50] sm:$0xff]  }
 0x160   :  { %v741_v46 = vor.u32 %v740_v41, %v737_v40  ;;  %v910_v4 = vor.u32 %v909_v1, %v905_v2  ;;  %2131 = vmatpush3.bf16.msra.mxu0 %v2310_v16  ;;  %v1773_v32 = vld [vmem:[%s2827_s6] ss:$0 sm:$0xff] }
 0x161   :  { %1869 = vst [vmem:[#allocation3 + $0x10] sm:$0xff] %v1862_v19   ;;  %v749_v45 = vor.u32 %v748_v38, %v745_v37  ;;  %2132 = vmatprep.subr.bf16.mxu0 %v2416_v0  ;;  %v2313_v19 = vld [vmem:[%s2828_s7 + $0x58] sm:$0xff]  }
 0x162   :  { %2049 = vmatpush3.bf16.msra.mxu1 %v2286_v18  ;;  %v2312_v18 = vld [vmem:[%s2828_s7 + $0x8] sm:$0xff]  }
 0x163   :  { %2050 = vmatprep.subr.bf16.mxu1 %v2416_v0  ;;  %v750_v48 = vsel %vm224_vm3, %v741_v46, %v749_v45 }
 0x164   :  { %2133 = vmatpush3.bf16.msra.mxu0 %v2312_v18 }
 0x165   :  { %2134 = vmatprep.subr.bf16.mxu0 %v2416_v0 }
 0x166   :  { %2051 = vmatpush3.bf16.msra.mxu1 %v2287_v20  ;;  %v2314_v20 = vld [vmem:[%s2828_s7 + $0x10] sm:$0xff]  }
 0x167   :  { %2052 = vmatprep.subr.bf16.mxu1 %v2416_v0 }
 0x168   :  { %v575_v23 = vld [vmem:[#allocation3 + $0x10] sm:$0xf]  ;;  %v576_v30 = vld [vmem:[#allocation3 + $0x14] sm:$0xf]  ;;  %2135 = vmatpush3.bf16.msra.mxu0 %v2314_v20 }
 0x169   :  { %v1724_v24 = vcombine.low %v574_v22, %v575_v23  ;;  %v1725_v33 = vcombine.low %v576_v30, %v576_v30  ;;  %v1736_v39 = vcombine.low %v575_v23, %v576_v30  ;;  %v2306_v59 = vld [vmem:[#allocation3 + $0xc] sm:$0xff]   ;;  %v2307_v5 = vld [vmem:[#allocation3 + $0x14] sm:$0x1f]   ;;  %2136 = vmatprep.subr.bf16.mxu0 %v2416_v0  ;;  %v2316_v22 = vld [vmem:[%s2828_s7 + $0x18] sm:$0xff]  }
 0x16a   :  { %2053 = vmatpush3.bf16.msra.mxu1 %v2288_v21  ;;  %v912_v62 = vshll.u32 %v2306_v59, 16  ;;  %v916_v7 = vshrl.u32 %v2306_v59, 16  ;;  %v920_v8 = vshll.u32 %v2307_v5, 16  ;;  %v924_v12 = vshrl.u32 %v2307_v5, 16  ;;  %v2315_v21 = vld [vmem:[%s2828_s7 + $0x60] sm:$0xff]   ;;  %v2317_v23 = vld [vmem:[%s2828_s7 + $0x68] sm:$0xff]  }
 0x16b   :  { %2039 = vmatmul.mubr.bf16.gmra.mrb[4].mxu1 %v1724_v24  ;;  %2054 = vmatprep.subr.bf16.mxu1 %v2416_v0  ;;  %v752_v43 = vshrl.u32 %v1736_v39, 16  ;;  %v755_v44 = vshll.u32 %v1736_v39, 16  ;;  %v2318_v24 = vld [vmem:[%s2828_s7 + $0x20] sm:$0xff]  }
 0x16c   :  { %2042 = vmatprep.mubr.msk.bf16.mxu1 %vm2417_vm0, %v2416_v0  ;;  %v914_v3 = vrot.slane %v912_v62, 1  ;;  %v922_v10 = vrot.slane %v920_v8, 1  ;;  %2137 = vmatpush3.bf16.msra.mxu0 %v2316_v22  ;;  %v1772_v30 = vld [vmem:[%s2826_s5] ss:$0 sm:$0xff] }
 0x16d   :  { %v754_v49 = vrot.slane %v752_v43, 3  ;;  %v757_v50 = vrot.slane %v755_v44, 4  ;;  %2138 = vmatprep.subr.bf16.mxu0 %v2416_v0 }
 0x16e   :  { %2055 = vmatpush3.bf16.msra.mxu1 %v2291_v25  ;;  %v915_v6 = vsel %vm369_vm4, %v910_v4, %v914_v3  ;;  %v918_v9 = vor.u32 %v916_v7, %v914_v3  ;;  %v926_v13 = vor.u32 %v924_v12, %v922_v10  ;;  %v2319_v25 = vld [vmem:[%s2828_s7 + $0x70] sm:$0xff]  }
 0x16f   :  { %2056 = vmatprep.subr.bf16.mxu1 %v2416_v0  ;;  %v758_v52 = vor.u32 %v757_v50, %v754_v49 }
 0x170   :  { %v923_v11 = vsel %vm369_vm4, %v918_v9, %v922_v10  ;;  %2139 = vmatpush3.bf16.msra.mxu0 %v2318_v24 }
 0x171   :  { %v759_v54 = vsel %vm224_vm3, %v749_v45, %v758_v52  ;;  %2140 = vmatprep.subr.bf16.mxu0 %v2416_v0 }
 0x172   :  { %2057 = vmatpush3.bf16.msra.mxu1 %v2292_v29  ;;  %v2326_v29 = vld [vmem:[%s2828_s7 + $0x38] sm:$0xff]  }
 0x173   :  { %2043 = vmatmul.mubr.bf16.gmra.mrb[8].mxu1 %v1725_v33  ;;  %2058 = vmatprep.subr.bf16.mxu1 %v2416_v0 }
 0x174   :  { %2062 = vmatprep.mubr.msk.bf16.mxu1 %vm2417_vm0, %v2416_v0  ;;  %2141 = vmatpush3.bf16.msra.mxu0 %v2320_v26 }
 0x175   :  { %2142 = vmatprep.subr.bf16.mxu0 %v2416_v0 }
 0x176   :  { %2059 = vmatpush3.bf16.msra.mxu1 %v2295_v36 }
 0x177   :  { %2060 = vmatprep.subr.bf16.mxu1 %v2416_v0 }
 0x178   :  { %2143 = vmatpush3.bf16.msra.mxu0 %v2322_v28 }
 0x179   :  { %2144 = vmatprep.subr.bf16.mxu0 %v2416_v0 }
 0x17a   :  { %2061 = vmatpush3.bf16.msra.mxu1 %v2296_v42 }
 0x17b   :  { %2074 = vmatprep.subr.bf16.mxu1 %v2416_v0 }
 0x17c   :  { %2145 = vmatpush3.bf16.msra.mxu0 %v2326_v29 }
 0x17d   :  { %2063 = vmatmul.mubr.bf16.vlgmr.msra.gmra.mrb[0].mxu1 %v750_v48  ;;  %2158 = vmatprep.subr.bf16.mxu0 %v2416_v0 }
 0x17e   :  { %2075 = vmatpush3.bf16.msra.mxu1 %v2297_v47  ;;  %2066 = vmatprep.mubr.msk.bf16.mxu1 %vm2417_vm0, %v2416_v0 }
 0x17f   :  { %2076 = vmatprep.subr.bf16.mxu1 %v2416_v0 }
 0x182   :  { %2077 = vmatpush3.bf16.msra.mxu1 %v2298_v51 }
 0x183   :  { %2078 = vmatprep.subr.bf16.mxu1 %v2416_v0 }
 0x185   :  { %2067 = vmatmul.mubr.bf16.gmra.mrb[4].mxu1 %v759_v54 }
 0x186   :  { %2079 = vmatpush3.bf16.msra.mxu1 %v2299_v53  ;;  %2070 = vmatprep.mubr.msk.bf16.mxu1 %vm2417_vm0, %v2416_v0 }
 0x187   :  { %2080 = vmatprep.subr.bf16.mxu1 %v2416_v0 }
 0x18a   :  { %2081 = vmatpush3.bf16.msra.mxu1 %v2300_v55 }
 0x18b   :  { %2082 = vmatprep.subr.bf16.mxu1 %v2416_v0 }
 0x18d   :  { %2071 = vmatmul.mubr.bf16.gmra.mrb[8].mxu1 %v758_v52 }
 0x18e   :  { %2083 = vmatpush3.bf16.msra.mxu1 %v2301_v56  ;;  %2090 = vmatprep.mubr.msk.bf16.mxu1 %vm2417_vm0, %v2416_v0 }
 0x18f   :  { %2084 = vmatprep.subr.bf16.mxu1 %v2416_v0 }
 0x192   :  { %2085 = vmatpush3.bf16.msra.mxu1 %v2302_v57 }
 0x193   :  { %2086 = vmatprep.subr.bf16.mxu1 %v2416_v0 }
 0x196   :  { %2087 = vmatpush3.bf16.msra.mxu1 %v2303_v60 }
 0x197   :  { %2088 = vmatprep.subr.bf16.mxu1 %v2416_v0 }
 0x19a   :  { %2089 = vmatpush3.bf16.msra.mxu1 %v2304_v63 }
 0x19b   :  { %2102 = vmatprep.subr.bf16.mxu1 %v2416_v0 }
 0x19d   :  { %2091 = vmatmul.mubr.bf16.vlgmr.msra.gmra.mrb[0].mxu1 %v915_v6 }
 0x19e   :  { %2094 = vmatprep.mubr.msk.bf16.mxu1 %vm2417_vm0, %v2416_v0  ;;  %2103 = vmatpush3.bf16.msra.mxu1 %v2308_v14 }
 0x19f   :  { %2104 = vmatprep.subr.bf16.mxu1 %v2416_v0 }
 0x1a2   :  { %2105 = vmatpush3.bf16.msra.mxu1 %v2309_v15 }
 0x1a3   :  { %2106 = vmatprep.subr.bf16.mxu1 %v2416_v0 }
 0x1a5   :  { %2095 = vmatmul.mubr.bf16.gmra.mrb[4].mxu1 %v923_v11 }
 0x1a6   :  { %2098 = vmatprep.mubr.msk.bf16.mxu1 %vm2417_vm0, %v2416_v0  ;;  %2107 = vmatpush3.bf16.msra.mxu1 %v2311_v17 }
 0x1a7   :  { %2108 = vmatprep.subr.bf16.mxu1 %v2416_v0 }
 0x1aa   :  { %2109 = vmatpush3.bf16.msra.mxu1 %v2313_v19 }
 0x1ab   :  { %2110 = vmatprep.subr.bf16.mxu1 %v2416_v0 }
 0x1ad   :  { %2099 = vmatmul.mubr.bf16.gmra.mrb[8].mxu1 %v926_v13 }
 0x1ae   :  { %2118 = vmatprep.mubr.msk.bf16.mxu1 %vm2417_vm0, %v2416_v0  ;;  %2111 = vmatpush3.bf16.msra.mxu1 %v2315_v21 }
 0x1af   :  { %2112 = vmatprep.subr.bf16.mxu1 %v2416_v0 }
 0x1b2   :  { %2113 = vmatpush3.bf16.msra.mxu1 %v2317_v23  ;;  %v1123_v23 = vld [vmem:[#allocation2] sm:$0x8] }
 0x1b3   :  { %2114 = vmatprep.subr.bf16.mxu1 %v2416_v0 }
 0x1b6   :  { %2115 = vmatpush3.bf16.msra.mxu1 %v2319_v25 }
 0x1b7   :  { %2116 = vmatprep.subr.bf16.mxu1 %v2416_v0 }
 0x1ba   :  { %2117 = vmatpush3.bf16.msra.mxu1 %v2321_v27  ;;  %v1126_v27 = vld [vmem:[#allocation2 + $0xc] sm:$0xf] }
 0x270   :  { %v1012_v31 = vpop.f32.mrb[0].mxu1 }
 0x271   :  { %v1044_v33 = vmul.f32 %v1772_v30, %v1012_v31  ;;  %v2092_v34 = vpop.f32.mrb[1].mxu1 }
 0x272   :  { %v1015_v35 = vpop.f32.mrb[2].mxu1 }
 0x273   :  { %v1055_v36 = vadd.f32 %v1773_v32, %v1044_v33  ;;  %v1045_v37 = vmul.f32 %v1772_v30, %v1015_v35  ;;  %v2093_v38 = vpop.f32.mrb[3].mxu1 }
 0x275   :  { %v1059_v39 = vmin.f32 %v1055_v36, 20.0  ;;  %v1056_v40 = vadd.f32 %v1773_v32, %v1045_v37  ;;  %vm1079_vm9 = vcmp.gt.f32.partialorder %v1055_v36, 20.0 }
 0x277   :  { %v1063_v41 = vmul.f32 1.442695, %v1059_v39  ;;  %v1060_v42 = vmin.f32 %v1056_v40, 20.0  ;;  %vm1080_vm10 = vcmp.gt.f32.partialorder %v1056_v40, 20.0 }
 0x278   :  { %v1020_v43 = vpop.f32.mrb[4].mxu1 }
 0x279   :  { %2357 = vpow2.f32 %v1063_v41  ;;  %v1065_v44 = vmul.f32 1.442695, %v1060_v42  ;;  %v2096_v45 = vpop.f32.mrb[5].mxu1 }
 0x27a   :  { %v1022_v46 = vpop.f32.mrb[6].mxu1 }
 0x27b   :  { %2359 = vpow2.f32 %v1065_v44  ;;  %v1046_v47 = vmul.f32 %v1772_v30, %v1022_v46  ;;  %v2097_v48 = vpop.f32.mrb[7].mxu1 }
 0x27d   :  { %v2748_v49 = vadd.f32 %v1773_v32, %v1046_v47 }
 0x27f   :  { %v1061_v50 = vmin.f32 %v2748_v49, 20.0  ;;  %vm1081_vm11 = vcmp.gt.f32.partialorder %v2748_v49, 20.0 }
 0x280   :  { %v1027_v51 = vpop.f32.mrb[8].mxu1 }
 0x281   :  { %v1067_v52 = vmul.f32 1.442695, %v1061_v50  ;;  %v1047_v53 = vmul.f32 %v1772_v30, %v1027_v51  ;;  %v2100_v54 = vpop.f32.mrb[9].mxu1  ;;  %v2327_v50 = vld [vmem:[%s2828_s7 + $0x80] sm:$0xff]  }
 0x282   :  { %v1030_v55 = vpop.f32.mrb[10].mxu1 }
 0x283   :  { %v2358_v56 = vpop.eup %2357  ;;  %2361 = vpow2.f32 %v1067_v52  ;;  %v1058_v57 = vadd.f32 %v1773_v32, %v1047_v53  ;;  %v2101_v58 = vpop.f32.mrb[11].mxu1 }
 0x284   :  { %v1071_v59 = vadd.f32 2.0, %v2358_v56 }
 0x285   :  { %v2360_v60 = vpop.eup %2359  ;;  %v1062_v61 = vmin.f32 %v1058_v57, 20.0  ;;  %vm1082_vm12 = vcmp.gt.f32.partialorder %v1058_v57, 20.0 }
 0x286   :  { %v1075_v62 = vmul.f32 %v2358_v56, %v1071_v59  ;;  %v1072_v63 = vadd.f32 2.0, %v2360_v60  ;;  %v2331_v56 = vld [vmem:[%s2828_s7 + $0x90] sm:$0xff]   ;;  %v2332_v59 = vld [vmem:[%s2828_s7 + $0x98] sm:$0xff]  }
 0x287   :  { %v1069_v1 = vmul.f32 1.442695, %v1062_v61 }
 0x288   :  { %v1087_v2 = vadd.f32 2.0, %v1075_v62  ;;  %v1076_v3 = vmul.f32 %v2360_v60, %v1072_v63  ;;  %v1083_v10 = vmul.f32 %v1075_v62, %v1055_v36 }
 0x289   :  { %2363 = vpow2.f32 %v1069_v1 }
 0x28a   :  { %2365 = vrcp.f32 %v1087_v2  ;;  %v1088_v4 = vadd.f32 2.0, %v1076_v3  ;;  %v1084_v14 = vmul.f32 %v1076_v3, %v1056_v40  ;;  %v2334_v2 = vld [vmem:[%s2828_s7 + $0xa0] sm:$0xff]   ;;  %v2335_v3 = vld [vmem:[%s2828_s7 + $0xa8] sm:$0xff]  }
 0x28c   :  { %2367 = vrcp.f32 %v1088_v4 }
 0x28d   :  { %v2362_v5 = vpop.eup %2361 }
 0x28e   :  { %v1073_v6 = vadd.f32 2.0, %v2362_v5 }
 0x290   :  { %v1077_v7 = vmul.f32 %v2362_v5, %v1073_v6  ;;  %v2336_v6 = vld [vmem:[%s2828_s7 + $0xb0] sm:$0xff]  }
 0x292   :  { %v1089_v8 = vadd.f32 2.0, %v1077_v7  ;;  %v1085_v25 = vmul.f32 %v1077_v7, %v2748_v49 }
 0x293   :  { %v2364_v9 = vpop.eup %2363 }
 0x294   :  { %v2366_v11 = vpop.eup %2365  ;;  %v1074_v12 = vadd.f32 2.0, %v2364_v9  ;;  %2369 = vrcp.f32 %v1089_v8 }
 0x295   :  { %v1095_v13 = vmul.f32 %v2366_v11, %v1083_v10 }
 0x296   :  { %v2368_v15 = vpop.eup %2367  ;;  %v1078_v16 = vmul.f32 %v2364_v9, %v1074_v12  ;;  %v2337_v9 = vld [vmem:[%s2828_s7 + $0xb8] sm:$0xff]  }
 0x297   :  { %v1099_v17 = vsel %vm1079_vm9, %v1055_v36, %v1095_v13  ;;  %v1096_v18 = vmul.f32 %v2368_v15, %v1084_v14 }
 0x298   :  { %v1855_v19 = vpack.c.bf16 %v1099_v17, %v1099_v17  ;;  %v1090_v20 = vadd.f32 2.0, %v1078_v16  ;;  %v1086_v30 = vmul.f32 %v1078_v16, %v1058_v57 }
 0x299   :  { %v1100_v21 = vsel %vm1080_vm10, %v1056_v40, %v1096_v18 }
 0x29a   :  { %1111 = vst [vmem:[#allocation2 + $0x4] sm:$0xf] %v1855_v19  ;;  %v1856_v22 = vpack.c.bf16 %v1100_v21, %v1100_v21  ;;  %2371 = vrcp.f32 %v1090_v20 }
 0x29c   :  { %1112 = vst [vmem:[#allocation2 + $0x8] sm:$0xf] %v1856_v22 }
 0x29e   :  { %v2370_v24 = vpop.eup %2369 }
 0x29f   :  { %v1097_v29 = vmul.f32 %v2370_v24, %v1085_v25 }
 0x2a1   :  { %v1124_v26 = vld [vmem:[#allocation2 + $0x4] sm:$0xf]  ;;  %v1101_v42 = vsel %vm1081_vm11, %v2748_v49, %v1097_v29  ;;  %v2328_v49 = vld [vmem:[%s2828_s7 + $0x88] sm:$0xff]  }
 0x2a2   :  { %v1805_v28 = vcombine.low %v1123_v23, %v1124_v26 }
 0x2a3   :  { %v1125_v31 = vld [vmem:[#allocation2 + $0x8] sm:$0xf] }
 0x2a4   :  { %v2372_v32 = vpop.eup %2371  ;;  %v1794_v33 = vcombine.low %v1124_v26, %v1125_v31  ;;  %v1806_v34 = vcombine.low %v1125_v31, %v1126_v27  ;;  %v1287_v35 = vshrl.u32 %v1805_v28, 16  ;;  %v1290_v36 = vshll.u32 %v1805_v28, 16  ;;  %v2338_v4 = vld [vmem:[#allocation2 + $0x4] sm:$0xff]  }
 0x2a5   :  { %v1098_v37 = vmul.f32 %v2372_v32, %v1086_v30  ;;  %v1459_v7 = vshll.u32 %v2338_v4, 16  ;;  %v1457_v11 = vshrl.u32 %v2338_v4, 16 }
 0x2a6   :  { %2119 = vmatmul.mubr.bf16.vlgmr.msra.gmra.mrb[12].mxu1 %v1794_v33  ;;  %v1289_v38 = vrot.slane %v1287_v35, 3  ;;  %v1292_v39 = vrot.slane %v1290_v36, 4  ;;  %v1295_v40 = vshrl.u32 %v1806_v34, 16  ;;  %v1298_v41 = vshll.u32 %v1806_v34, 16 }
 0x2a7   :  { %v1102_v43 = vsel %vm1082_vm12, %v1058_v57, %v1098_v37  ;;  %2122 = vmatprep.mubr.msk.bf16.mxu1 %vm2417_vm0, %v2416_v0  ;;  %v1461_v10 = vrot.slane %v1459_v7, 1 }
 0x2a8   :  { %v1867_v44 = vpack.c.bf16 %v1102_v43, %v1101_v42  ;;  %v1297_v45 = vrot.slane %v1295_v40, 3  ;;  %v1300_v46 = vrot.slane %v1298_v41, 4  ;;  %v1293_v47 = vor.u32 %v1292_v39, %v1289_v38  ;;  %v1844_v38 = vld [vmem:[%s2830_s9] ss:$0 sm:$0xff] }
 0x2a9   :  { %v1462_v13 = vor.u32 %v1461_v10, %v1457_v11 }
 0x2aa   :  { %1870 = vst [vmem:[#allocation2 + $0x10] sm:$0xff] %v1867_v44   ;;  %v1301_v48 = vor.u32 %v1300_v46, %v1297_v45 }
 0x2ac   :  { %v1302_v51 = vsel %vm224_vm3, %v1293_v47, %v1301_v48 }
 0x2ad   :  { %2147 = vmatmul.mubr.bf16.vlgmr.msra.gmra.mrb[12].mxu0 %v1302_v51 }
 0x2ae   :  { %2159 = vmatpush3.bf16.msra.mxu0 %v2327_v50  ;;  %2150 = vmatprep.mubr.msk.bf16.mxu0 %vm2417_vm0, %v2416_v0 }
 0x2af   :  { %2160 = vmatprep.subr.bf16.mxu0 %v2416_v0 }
 0x2b1   :  { %v1127_v52 = vld [vmem:[#allocation2 + $0x10] sm:$0xf]  ;;  %v1128_v53 = vld [vmem:[#allocation2 + $0x14] sm:$0xf] }
 0x2b2   :  { %2161 = vmatpush3.bf16.msra.mxu0 %v2328_v49  ;;  %v1795_v54 = vcombine.low %v1126_v27, %v1127_v52  ;;  %v1807_v55 = vcombine.low %v1127_v52, %v1128_v53  ;;  %v1796_v1 = vcombine.low %v1128_v53, %v1128_v53  ;;  %v2339_v5 = vld [vmem:[#allocation2 + $0xc] sm:$0xff]   ;;  %v2340_v14 = vld [vmem:[#allocation2 + $0x14] sm:$0x1f]  }
 0x2b3   :  { %2162 = vmatprep.subr.bf16.mxu0 %v2416_v0  ;;  %v1464_v8 = vshll.u32 %v2339_v5, 16  ;;  %v1468_v16 = vshrl.u32 %v2339_v5, 16  ;;  %v1472_v17 = vshll.u32 %v2340_v14, 16  ;;  %v1476_v21 = vshrl.u32 %v2340_v14, 16 }
 0x2b4   :  { %2123 = vmatmul.mubr.bf16.gmra.mrb[16].mxu1 %v1795_v54  ;;  %v1304_v57 = vshrl.u32 %v1807_v55, 16  ;;  %v1307_v58 = vshll.u32 %v1807_v55, 16 }
 0x2b5   :  { %2126 = vmatprep.mubr.msk.bf16.mxu1 %vm2417_vm0, %v2416_v0  ;;  %v1466_v12 = vrot.slane %v1464_v8, 1  ;;  %v1474_v19 = vrot.slane %v1472_v17, 1 }
 0x2b6   :  { %2163 = vmatpush3.bf16.msra.mxu0 %v2331_v56  ;;  %v1306_v60 = vrot.slane %v1304_v57, 3  ;;  %v1309_v61 = vrot.slane %v1307_v58, 4 }
 0x2b7   :  { %2164 = vmatprep.subr.bf16.mxu0 %v2416_v0  ;;  %v1467_v15 = vsel %vm369_vm4, %v1462_v13, %v1466_v12  ;;  %v1470_v18 = vor.u32 %v1468_v16, %v1466_v12  ;;  %v1478_v22 = vor.u32 %v1476_v21, %v1474_v19 }
 0x2b8   :  { %v1310_v62 = vor.u32 %v1309_v61, %v1306_v60 }
 0x2b9   :  { %v1475_v20 = vsel %vm369_vm4, %v1470_v18, %v1474_v19 }
 0x2ba   :  { %2165 = vmatpush3.bf16.msra.mxu0 %v2332_v59  ;;  %v1311_v63 = vsel %vm224_vm3, %v1301_v48, %v1310_v62 }
 0x2bb   :  { %2151 = vmatmul.mubr.bf16.gmra.mrb[16].mxu0 %v1311_v63  ;;  %2166 = vmatprep.subr.bf16.mxu0 %v2416_v0 }
 0x2bc   :  { %2127 = vmatmul.mubr.bf16.gmra.mrb[20].mxu1 %v1796_v1  ;;  %2154 = vmatprep.mubr.msk.bf16.mxu0 %vm2417_vm0, %v2416_v0 }
 0x2be   :  { %2167 = vmatpush3.bf16.msra.mxu0 %v2334_v2 }
 0x2bf   :  { %2168 = vmatprep.subr.bf16.mxu0 %v2416_v0 }
 0x2c2   :  { %2169 = vmatpush3.bf16.msra.mxu0 %v2335_v3 }
 0x2c3   :  { %2155 = vmatmul.mubr.bf16.gmra.mrb[20].mxu0 %v1310_v62  ;;  %2170 = vmatprep.subr.bf16.mxu0 %v2416_v0 }
 0x2c4   :  { %2174 = vmatprep.mubr.msk.bf16.mxu0 %vm2417_vm0, %v2416_v0 }
 0x2c6   :  { %2171 = vmatpush3.bf16.msra.mxu0 %v2336_v6 }
 0x2c7   :  { %2172 = vmatprep.subr.bf16.mxu0 %v2416_v0 }
 0x2ca   :  { %2173 = vmatpush3.bf16.msra.mxu0 %v2337_v9 }
 0x2cd   :  { %2175 = vmatmul.mubr.bf16.vlgmr.msra.gmra.mrb[12].mxu0 %v1467_v15 }
 0x2ce   :  { %2178 = vmatprep.mubr.msk.bf16.mxu0 %vm2417_vm0, %v2416_v0 }
 0x2d5   :  { %2179 = vmatmul.mubr.bf16.gmra.mrb[16].mxu0 %v1475_v20 }
 0x2d6   :  { %2182 = vmatprep.mubr.msk.bf16.mxu0 %vm2417_vm0, %v2416_v0  ;;  %v1843_v0 = vld [vmem:[%s2829_s8] ss:$0 sm:$0xff] }
 0x2dd   :  { %2183 = vmatmul.mubr.bf16.gmra.mrb[20].mxu0 %v1478_v22 }
 0x379   :  { %v1260_v23 = vpop.f32.mrb[12].mxu1 }
 0x37a   :  { %v2120_v24 = vpop.f32.mrb[13].mxu1 }
 0x37b   :  { %v1263_v25 = vpop.f32.mrb[14].mxu1 }
 0x37c   :  { %v2121_v26 = vpop.f32.mrb[15].mxu1 }
 0x387   :  { %v1268_v27 = vpop.f32.mrb[16].mxu1 }
 0x388   :  { %v2124_v28 = vpop.f32.mrb[17].mxu1 }
 0x389   :  { %v1270_v29 = vpop.f32.mrb[18].mxu1 }
 0x38a   :  { %v2125_v30 = vpop.f32.mrb[19].mxu1 }
 0x38f   :  { %v1275_v31 = vpop.f32.mrb[20].mxu1 }
 0x390   :  { %v2128_v32 = vpop.f32.mrb[21].mxu1 }
 0x391   :  { %v1278_v33 = vpop.f32.mrb[22].mxu1 }
 0x392   :  { %v2129_v34 = vpop.f32.mrb[23].mxu1 }
 0x3a0   :  { %v1564_v35 = vpop.f32.mrb[12].mxu0 }
 0x3a1   :  { %v2186_v36 = vadd.f32 %v1564_v35, %v1260_v23  ;;  %v2176_v37 = vpop.f32.mrb[13].mxu0 }
 0x3a2   :  { %v1567_v39 = vpop.f32.mrb[14].mxu0 }
 0x3a3   :  { %v1596_v40 = vmul.f32 %v2186_v36, %v1843_v0  ;;  %v2187_v41 = vadd.f32 %v1567_v39, %v1263_v25  ;;  %v2177_v42 = vpop.f32.mrb[15].mxu0 }
 0x3a5   :  { %v1607_v43 = vadd.f32 %v1844_v38, %v1596_v40  ;;  %v1597_v44 = vmul.f32 %v2187_v41, %v1843_v0 }
 0x3a7   :  { %v1611_v45 = vmin.f32 %v1607_v43, 20.0  ;;  %v1608_v46 = vadd.f32 %v1844_v38, %v1597_v44  ;;  %vm1631_vm13 = vcmp.gt.f32.partialorder %v1607_v43, 20.0 }
 0x3a8   :  { %v1572_v47 = vpop.f32.mrb[16].mxu0 }
 0x3a9   :  { %v1615_v48 = vmul.f32 1.442695, %v1611_v45  ;;  %v1612_v50 = vmin.f32 %v1608_v46, 20.0  ;;  %v2180_v51 = vpop.f32.mrb[17].mxu0  ;;  %vm1632_vm14 = vcmp.gt.f32.partialorder %v1608_v46, 20.0 }
 0x3aa   :  { %v1574_v49 = vpop.f32.mrb[18].mxu0 }
 0x3ab   :  { %2373 = vpow2.f32 %v1615_v48  ;;  %v1617_v52 = vmul.f32 1.442695, %v1612_v50  ;;  %v2188_v53 = vadd.f32 %v1574_v49, %v1270_v29  ;;  %v2181_v54 = vpop.f32.mrb[19].mxu0 }
 0x3ad   :  { %2375 = vpow2.f32 %v1617_v52  ;;  %v1598_v55 = vmul.f32 %v2188_v53, %v1843_v0 }
 0x3af   :  { %v1609_v56 = vadd.f32 %v1844_v38, %v1598_v55 }
 0x3b0   :  { %v1579_v57 = vpop.f32.mrb[20].mxu0 }
 0x3b1   :  { %v1613_v58 = vmin.f32 %v1609_v56, 20.0  ;;  %v2189_v59 = vadd.f32 %v1579_v57, %v1275_v31  ;;  %v2184_v60 = vpop.f32.mrb[21].mxu0  ;;  %vm1633_vm15 = vcmp.gt.f32.partialorder %v1609_v56, 20.0 }
 0x3b2   :  { %v1582_v61 = vpop.f32.mrb[22].mxu0 }
 0x3b3   :  { %v1619_v62 = vmul.f32 1.442695, %v1613_v58  ;;  %v1599_v63 = vmul.f32 %v2189_v59, %v1843_v0  ;;  %v2185_v1 = vpop.f32.mrb[23].mxu0 }
 0x3b5   :  { %v2374_v2 = vpop.eup %2373  ;;  %2377 = vpow2.f32 %v1619_v62  ;;  %v1610_v3 = vadd.f32 %v1844_v38, %v1599_v63 }
 0x3b6   :  { %v1623_v4 = vadd.f32 2.0, %v2374_v2 }
 0x3b7   :  { %v2376_v5 = vpop.eup %2375  ;;  %v1614_v6 = vmin.f32 %v1610_v3, 20.0  ;;  %vm1634_vm0 = vcmp.gt.f32.partialorder %v1610_v3, 20.0 }
 0x3b8   :  { %v1627_v7 = vmul.f32 %v2374_v2, %v1623_v4  ;;  %v1624_v8 = vadd.f32 2.0, %v2376_v5 }
 0x3b9   :  { %v1621_v9 = vmul.f32 1.442695, %v1614_v6 }
 0x3ba   :  { %v1639_v10 = vadd.f32 2.0, %v1627_v7  ;;  %v1628_v11 = vmul.f32 %v2376_v5, %v1624_v8  ;;  %v1635_v18 = vmul.f32 %v1627_v7, %v1607_v43 }
 0x3bb   :  { %2379 = vpow2.f32 %v1621_v9 }
 0x3bc   :  { %2381 = vrcp.f32 %v1639_v10  ;;  %v1640_v12 = vadd.f32 2.0, %v1628_v11  ;;  %v1636_v22 = vmul.f32 %v1628_v11, %v1608_v46 }
 0x3be   :  { %2383 = vrcp.f32 %v1640_v12 }
 0x3bf   :  { %v2378_v13 = vpop.eup %2377 }
 0x3c0   :  { %v1625_v14 = vadd.f32 2.0, %v2378_v13 }
 0x3c2   :  { %v1629_v15 = vmul.f32 %v2378_v13, %v1625_v14 }
 0x3c4   :  { %v1641_v16 = vadd.f32 2.0, %v1629_v15  ;;  %v1637_v29 = vmul.f32 %v1629_v15, %v1609_v56 }
 0x3c5   :  { %v2380_v17 = vpop.eup %2379 }
 0x3c6   :  { %v2382_v19 = vpop.eup %2381  ;;  %2385 = vrcp.f32 %v1641_v16  ;;  %v1626_v20 = vadd.f32 2.0, %v2380_v17 }
 0x3c7   :  { %v1647_v21 = vmul.f32 %v2382_v19, %v1635_v18 }
 0x3c8   :  { %v2384_v23 = vpop.eup %2383  ;;  %v1630_v24 = vmul.f32 %v2380_v17, %v1626_v20 }
 0x3c9   :  { %v1651_v25 = vsel %vm1631_vm13, %v1607_v43, %v1647_v21  ;;  %v1648_v26 = vmul.f32 %v2384_v23, %v1636_v22 }
 0x3ca   :  { %1655 = vst [vmem:[%s2831_s10] sm:$0xff] %v1651_v25  ;;  %v1642_v27 = vadd.f32 2.0, %v1630_v24  ;;  %v1638_v33 = vmul.f32 %v1630_v24, %v1610_v3 }
 0x3cb   :  { %v1652_v28 = vsel %vm1632_vm14, %v1608_v46, %v1648_v26 }
 0x3cc   :  { %1656 = vst [vmem:[%s2831_s10 + $0x8] sm:$0xff] %v1652_v28  ;;  %2387 = vrcp.f32 %v1642_v27 }
 0x3d0   :  { %v2386_v30 = vpop.eup %2385 }
 0x3d1   :  { %v1649_v31 = vmul.f32 %v2386_v30, %v1637_v29 }
 0x3d3   :  { %v1653_v32 = vsel %vm1633_vm15, %v1609_v56, %v1649_v31 }
 0x3d4   :  { %1845 = vst [vmem:[%s2831_s10 + $0x10] sm:$0xff] %v1653_v32 }
 0x3d6   :  { %v2388_v34 = vpop.eup %2387 }
 0x3d7   :  { %v1650_v35 = vmul.f32 %v2388_v34, %v1638_v33 }
 0x3d9   :  { %v1654_v0 = vsel %vm1634_vm0, %v1610_v3, %v1650_v35 }
 0x3da   :  { %1846 = vst [vmem:[%s2831_s10 + $0x18] sm:$0xff] %v1654_v0 }
 0x3db   :  { %1664 = vsyncpa [#allocation5], 1 }

</bundles_post_ra>
